<compile_context>
chip_gen: v6e
topology: v6e:2x2x1
jax: 0.10.0
libtpu: 0.0.40
codegen_flags: <defaults>
</compile_context>

<pallas_src>
import jax
import jax.numpy as jnp
from jax.experimental import pallas as pl
from jax.experimental.pallas import tpu as pltpu

_LANES = 128
_SMALL_BYTES = 1024 * 1024      # below this a fused XLA exp wins over kernel dispatch


def _exp_kernel(x_ref, o_ref):
    # Elementwise exp on the resident VMEM tile (transcendental -> EUP slot).
    # The kernel is HBM-bandwidth bound; block/grid choice is all that matters.
    o_ref[...] = jnp.exp(x_ref[...])


def _round_up(a: int, b: int) -> int:
    return ((a + b - 1) // b) * b


def _chip_config():
    """Per-generation (block_bytes, vmem_limit_bytes, min_blocks, even_grid)."""
    try:
        kind = jax.devices()[0].device_kind.lower()
    except Exception:
        kind = ""
    if "v7" in kind or "7x" in kind:
        # v7x: ~3.2 TB/s per TC -> big blocks amortize the ~0.35us/step cost;
        # 2 TCs -> want >= 2 blocks per core and an even block count.
        # 4 x 8 MiB = 32 MiB residency needs the scoped-VMEM limit raised
        # (64 MiB physical, default scoped limit is 32 MiB).
        return (8 << 20, 40 << 20, 4, True)
    if "v6" in kind:
        # v6e: single TC, 128 MiB physical VMEM; 6 MiB blocks (24 MiB resident).
        return (6 << 20, 40 << 20, 1, False)
    if "v5 lite" in kind or "v5e" in kind or "v5lite" in kind:
        # v5e: 16 MiB scoped-VMEM default and ~0.8 TB/s HBM -> 2 MiB blocks
        # (8 MiB resident) already amortize the step cost; stay under default.
        return (2 << 20, None, 1, False)
    # v4 / v5p / unknown: assume megacore (2 TCs) and generous VMEM.
    return (4 << 20, None, 2, True)


def _run_exp_2d(x2d, itemsize, block_bytes, vmem_limit, min_blocks, even_grid):
    """Run the exp kernel over a lane-dense (rows, 128) slab."""
    rows, lanes = x2d.shape
    dtype = x2d.dtype

    # dtype-aware sublane granule: 8 rows (32-bit), 16 (bf16/f16), 32 (8-bit).
    sub = 8 * max(1, 4 // itemsize)

    # Largest row tile that keeps one block under the per-generation target.
    tr_cap = max(sub, (block_bytes // (lanes * itemsize)) // sub * sub)
    g = pl.cdiv(rows, tr_cap)
    g = max(g, min_blocks)              # only >1 on multi-TensorCore chips
    if even_grid and g > 1 and (g % 2):
        g += 1                          # balanced halves across the two cores
    tr = _round_up(pl.cdiv(rows, g), sub)
    tr = max(sub, min(tr, _round_up(rows, sub)))
    grid = (pl.cdiv(rows, tr),)         # non-divisible edge block is masked by Pallas

    cp_kwargs = dict(dimension_semantics=("parallel",))
    if vmem_limit is not None:
        cp_kwargs["vmem_limit_bytes"] = vmem_limit

    return pl.pallas_call(
        _exp_kernel,
        out_shape=jax.ShapeDtypeStruct((rows, lanes), dtype),
        grid_spec=pltpu.PrefetchScalarGridSpec(
            num_scalar_prefetch=0,
            grid=grid,
            in_specs=[pl.BlockSpec((tr, lanes), lambda i: (i, 0))],
            out_specs=pl.BlockSpec((tr, lanes), lambda i: (i, 0)),
        ),
        compiler_params=pltpu.CompilerParams(**cp_kwargs),
        cost_estimate=pl.CostEstimate(
            flops=0,
            transcendentals=rows * lanes,
            bytes_accessed=2 * rows * lanes * itemsize,
        ),
    )(x2d)


def exponential(x: jax.Array) -> jax.Array:
    """Elementwise exp (torch.exp equivalent) via a Pallas TPU kernel."""
    orig_shape = x.shape
    n = x.size
    itemsize = jnp.dtype(x.dtype).itemsize

    if n == 0:
        return x

    # Small-input short circuit: fused XLA exp beats kernel dispatch + DMA setup.
    if n * itemsize < _SMALL_BYTES:
        return jnp.exp(x)

    block_bytes, vmem_limit, min_blocks, even_grid = _chip_config()

    rem = n % _LANES
    n_main = n - rem

    if rem == 0:
        # Common case: free reshape to a lane-dense (rows, 128) slab, no copies.
        x2d = jnp.ravel(x).reshape(n // _LANES, _LANES)
        out2d = _run_exp_2d(x2d, itemsize, block_bytes, vmem_limit,
                            min_blocks, even_grid)
        return out2d.reshape(orig_shape)

    # Ragged element count (rare): run the kernel on the largest 128-multiple
    # prefix and compute the <128-element tail with plain exp -- no whole-array
    # pad / output slice copies.
    x_flat = jnp.ravel(x)
    x2d = x_flat[:n_main].reshape(n_main // _LANES, _LANES)
    out_main = _run_exp_2d(x2d, itemsize, block_bytes, vmem_limit,
                           min_blocks, even_grid)
    out_tail = jnp.exp(x_flat[n_main:])
    out_flat = jnp.concatenate([out_main.reshape(-1), out_tail])
    return out_flat.reshape(orig_shape)


if __name__ == "__main__":
    key = jax.random.PRNGKey(0)
    k1, k2, k3 = jax.random.split(key, 3)

    # 1) Canonical small NCHW activation, matching a typical call site
    #    (goes through the small-input fast path).
    x_small = jax.random.normal(k1, (2, 4, 16, 16), dtype=jnp.float32)
    y_small = jax.block_until_ready(exponential(x_small))
    assert y_small.shape == x_small.shape and y_small.dtype == x_small.dtype
    assert jnp.allclose(y_small, jnp.exp(x_small), rtol=1e-6, atol=1e-6)

    # 2) ~2 MiB NCHW activation -> Pallas kernel path (128-divisible, lane-dense,
    #    generation-tuned grid).
    x_big = jax.random.normal(k2, (2, 16, 128, 128), dtype=jnp.float32)
    y_big = jax.block_until_ready(exponential(x_big))
    assert y_big.shape == x_big.shape and y_big.dtype == x_big.dtype
    assert jnp.allclose(y_big, jnp.exp(x_big), rtol=1e-6, atol=1e-6)

    # 3) ~1 MiB ragged element count (not a multiple of 128): kernel on the
    #    128-multiple prefix + plain-exp tail (no pad/slice copies).
    x_ragged = jax.random.normal(k3, (3, 5, 103, 173), dtype=jnp.float32)
    y_ragged = jax.block_until_ready(exponential(x_ragged))
    assert y_ragged.shape == x_ragged.shape and y_ragged.dtype == x_ragged.dtype
    assert jnp.allclose(y_ragged, jnp.exp(x_ragged), rtol=1e-6, atol=1e-6)

    print("KERNEL_OK")
</pallas_src>

<mosaic_0001>
module attributes {stable_mosaic.version = 11 : i64} {
  func.func @_exp_kernel(%arg0: i32, %arg1: memref<2048x128xf32, #tpu.memory_space<vmem>>, %arg2: memref<2048x128xf32, #tpu.memory_space<vmem>>) attributes {dimension_semantics = [#tpu.dimension_semantics<parallel>], iteration_bounds = array<i64: 2>, scalar_prefetch = 0 : i64, scratch_operands = 0 : i64, tpu.core_type = #tpu.core_type<tc>, window_params = [{transform_indices = @transform_0, window_bounds = array<i64: 2048, 128>}, {transform_indices = @transform_1, window_bounds = array<i64: 2048, 128>}]} {
    %c0 = arith.constant 0 : index
    %c0_0 = arith.constant 0 : index
    %0 = vector.load %arg1[%c0, %c0_0] : memref<2048x128xf32, #tpu.memory_space<vmem>>, vector<2048x128xf32>
    %1 = math.exp %0 : vector<2048x128xf32>
    %c0_1 = arith.constant 0 : index
    %c0_2 = arith.constant 0 : index
    %2 = vector.load %arg2[%c0_1, %c0_2] : memref<2048x128xf32, #tpu.memory_space<vmem>>, vector<2048x128xf32>
    tpu.vector_store %arg2[%c0_1, %c0_2], %1 {strides = array<i32>} : memref<2048x128xf32, #tpu.memory_space<vmem>>, vector<2048x128xf32>,
    return
  }
  func.func @transform_0(%arg0: i32) -> (i32, i32) {
    %c0_i32 = arith.constant 0 : i32
    %c0_i32_0 = arith.constant 0 : i32
    return %arg0, %c0_i32 : i32, i32
  }
  func.func @transform_1(%arg0: i32) -> (i32, i32) {
    %c0_i32 = arith.constant 0 : i32
    %c0_i32_0 = arith.constant 0 : i32
    return %arg0, %c0_i32 : i32, i32
  }
}

</mosaic_0001>

<bundles_post_ra>
// kernel: tpu_custom_call.1
= control target key start
LH: loop header
LB: loop body
LE: loop exit
PB: predicated region body
PF: predicated region fallthrough
CT: control target
= control target key end

     0   :  { %6 = vsyncpa [#allocation3], 0  ;;  %s2611_s0 = inlined_call_operand.hbm [shape: f32[4096,128], index: 0, kind: input, shape index: {}]   ;;  %s2612_s1 = inlined_call_operand.hbm [shape: f32[4096,128], index: 1, kind: output, shape index: {}]  }
   0x1   :  { %8 = vsyncpa [#allocation3 + $0x1], 0 }
   0x2   :  { %9 = vsyncpa [#allocation4], 0 }
   0x3   :  { %11 = vsyncpa [#allocation4 + $0x1], 0  ;;  %s1936_s6 = smov 0   ;;  %s1938_s7 = smov 0  }
   0x4   :  { %s1940_s8 = smov 0   ;;  %s1942_s9 = smov 0  }
   0x5 LB: > { %s1957_s10 = sadd.s32 4294967295, %s1918_s9   ;;  %s1248_s11 = sadd.s32 4294967294, %s1918_s9   ;;  %s1918_s9 = sphi %s1942_s9, %s2627_s9   ;;  %s1914_s8 = sphi %s1940_s8, %s2626_s8   ;;  %s1910_s7 = sphi %s1938_s7, %s2625_s7   ;;  %s1906_s6 = sphi %s1936_s6, %s2624_s6  }
   0x6   : > { %s1961_s12 = sadd.s32 1, %s1918_s9   ;;  %s24_s13 = sadd.s32 1, %s1914_s8 }
   0x7   : > { %s21_s14 = ssub.s32 %s1918_s9, %s1961_s12  ;;  %p31_p0 = scmp.ne.s32.totalorder %s1914_s8, %s1910_s7 }
   0x8   : > { %p22_p1 = scmp.eq.s32.totalorder %s21_s14, 0  ;;  %p32_p2 = scmp.eq.s32.totalorder %s1918_s9, 0 }
   0x9   : > { %p37_p3 = scmp.ne.s32.totalorder %s1910_s7, %s1906_s6  ;;  %p38_p4 = scmp.eq.s32.totalorder %s1957_s10, 0 }
   0xa   : > { %s1973_s15 = scalar_select %p22_p1, %s1914_s8, %s24_s13  }
   0xb   : > { %p1975_p5 = por %p32_p2, %p31_p0  ;;  %p1979_p6 = por %p38_p4, %p37_p3 }
   0xc   : > { %p61_p7 = scmp.eq.s32.totalorder %s1957_s10, 1  ;;  %p67_p8 = scmp.eq.s32.totalorder %s1248_s11, 1 }
   0xd   : > { %s2616_s17 = scalar_select %p1979_p6, 1, 0 }
   0xe   : > { %p1276_p10 = scmp.lt.s32.totalorder %s1918_s9, 2  ;;  %p1986_p11 = por %p61_p7, %p31_p0 }
   0xf   : > { %p1990_p12 = por %p67_p8, %p37_p3  ;;  %s87_s20 = sand.u32 1, %s1914_s8  }
  0x10   : > { %s2617_s18 = scalar_select %p1986_p11, 1, 0 }
  0x11   : > { %s2618_s19 = scalar_select %p1990_p12, 1, 0 }
  0x12   : > { %s1262_s21 = sshll.u32 %s1918_s9, 15  ;;  %s1251_s22 = sshll.u32 %s87_s20, 11 }
  0x13   : > { %s1999_s25 = scalar_lea.hbm %s2611_s0, %s1262_s21  ;;  %s91_s26 = scalar_lea.vmem [#allocation2], %s1251_s22 }
  0x14   : > { %s98_s27 = sshll.u32 %s91_s26, 4  ;;  %p2003_p13 = pnand %p1276_p10, %p1975_p5  ;;  %s2007_s27 = int_to_ptr.vmem [resolvable:$true] %s98_s27 }
  0x15   : > { %s2009_s29 = scalar_lea.sflag [#allocation3], %s87_s20  ;;  %s1826_s30 = scalar_lea.hbm %s1999_s25, 32768 }
  0x16   : > { %p1827_p0 = scmp.ne.s32.totalorder %s1999_s25, %s1826_s30  ;;  %p1828_p1 = pneg %p2003_p13 }
  0x17   : > { %s1831_s4 = scalar_lea.hbm %s2611_s0, 65536  ;;  %p1832_p4 = scmp.lt.s32.totalorder %s1999_s25, %s2611_s0 }
  0x18   : > { %p1829_p2 = pnand %p1828_p1, %p1827_p0  ;;  %p1833_p5 = scmp.lt.s32.totalorder %s1831_s4, %s1826_s30 }
  0x1a   : > { %p1830_p3 = pneg %p1829_p2  ;;  %p1834_p7 = por %p1833_p5, %p1832_p4 }
  0x1c   : > { %p1835_p8 = pnand %p1834_p7, %p1830_p3 }
  0x1e   : > { %1838 = shalt.err (!%p1835_p8)
}
  0x1f   : > { %s1839_s13 = scalar_lea.vmem %s2007_s27, 32768  ;;  %s1920_s14 = smov [#allocation2]  }
  0x20   : > { %p1840_p10 = scmp.ne.s32.totalorder %s2007_s27, %s1839_s13  ;;  %s1844_s16 = sshll.u32 %s1920_s14, 4  ;;  %s1845_s16 = int_to_ptr.vmem [resolvable:$false] %s1844_s16 }
  0x21   : > { %s1846_s20 = scalar_lea.vmem %s1845_s16, 65536  ;;  %p1847_p2 = scmp.lt.s32.totalorder %s2007_s27, %s1845_s16 }
  0x22   : > { %p1842_p9 = pnand %p1840_p10, %p1828_p1  ;;  %p1848_p12 = scmp.lt.s32.totalorder %s1846_s20, %s1839_s13 }
  0x24   : > { %p1843_p0 = pneg %p1842_p9  ;;  %p1849_p11 = por %p1848_p12, %p1847_p2 }
  0x26   : > { %p1850_p6 = pnand %p1849_p11, %p1843_p0 }
  0x28   : > { %1853 = shalt.err (!%p1850_p6)
}
  0x29   : > { %s1921_s21 = smov 128   ;;  %s1922_s22 = smov 8  }
  0x2a   : > { %1271 = dma.hbm_to_vmem [thread:$0]  (!%p2003_p13), %s1999_s25, 32768, %s2007_s27, %s2009_s29, %s1921_s21, %s1921_s21, %s1922_s22  }
  0x2b   : > { %p1254_p9 = scmp.ge.s32.totalorder %s1918_s9, 1  ;;  %p106_p1 = scmp.lt.s32.totalorder %s1918_s9, 3 }
  0x2d   : > { %p107_p3 = pnand %p1254_p9, %p106_p1 }
  0x2e   : > { %s2033_s23 = sand.u32 (!%p107_p3), 1, %s1910_s7   ;;  %p2620_p6 = scmp.ne.s32.totalorder (!%p107_p3), %s2616_s17, 0 }
  0x2f   : > { %110 = sbr.rel (%p107_p3) target bundleno = 339 (0x153), region = 24  ;;  %s1255_s24 = sshll.u32 (!%p107_p3), %s2033_s23, 11 }
  0x30   : > { %s113_s26 = scalar_lea.sflag (!%p107_p3), [#allocation3], %s2033_s23  ;;  %s2039_s30 = scalar_lea.vmem (!%p107_p3), [#allocation2], %s1255_s24 }
  0x34   : > { %1897 = dma.done.wait (%p2620_p6), %s113_s26, 32768  }
  0x35   : > { %1899 = vsyncadd (%p2620_p6), %s113_s26, 4294934528  ;;  %v137_v0 = vld [vmem:[%s2039_s30] sm:$0xff]  ;;  %v138_v1 = vld [vmem:[%s2039_s30 + $0x8] sm:$0xff]  ;;  %s2068_s17 = scalar_lea.vmem [#allocation5], %s1255_s24  ;;  %s1263_s25 = sshll.u32 %s1957_s10, 15 }
  0x36   : > { %v139_v2 = vld [vmem:[%s2039_s30 + $0x10] sm:$0xff]  ;;  %v393_v3 = vmul.f32 1.442695, %v137_v0  ;;  %v395_v4 = vmul.f32 1.442695, %v138_v1  ;;  %v140_v6 = vld [vmem:[%s2039_s30 + $0x18] sm:$0xff]  ;;  %s2563_s2 = scalar_lea.hbm %s2612_s1, %s1263_s25 }
  0x37   : > { %v397_v5 = vmul.f32 1.442695, %v139_v2  ;;  %v141_v7 = vld [vmem:[%s2039_s30 + $0x20] sm:$0xff]  ;;  %v142_v8 = vld [vmem:[%s2039_s30 + $0x28] sm:$0xff]  ;;  %v399_v9 = vmul.f32 1.442695, %v140_v6 }
  0x38   : > { %1314 = vpow2.f32 %v393_v3  ;;  %v401_v10 = vmul.f32 1.442695, %v141_v7  ;;  %v403_v11 = vmul.f32 1.442695, %v142_v8  ;;  %v143_v12 = vld [vmem:[%s2039_s30 + $0x30] sm:$0xff]  ;;  %v144_v13 = vld [vmem:[%s2039_s30 + $0x38] sm:$0xff] }
  0x39   : > { %1316 = vpow2.f32 %v395_v4  ;;  %v145_v14 = vld [vmem:[%s2039_s30 + $0x40] sm:$0xff]  ;;  %v405_v15 = vmul.f32 1.442695, %v143_v12  ;;  %v407_v16 = vmul.f32 1.442695, %v144_v13  ;;  %v146_v17 = vld [vmem:[%s2039_s30 + $0x48] sm:$0xff] }
  0x3a   : > { %1318 = vpow2.f32 %v397_v5  ;;  %v147_v18 = vld [vmem:[%s2039_s30 + $0x50] sm:$0xff]  ;;  %v409_v19 = vmul.f32 1.442695, %v145_v14  ;;  %v148_v20 = vld [vmem:[%s2039_s30 + $0x58] sm:$0xff]  ;;  %v411_v21 = vmul.f32 1.442695, %v146_v17 }
  0x3b   : > { %1320 = vpow2.f32 %v399_v9  ;;  %v149_v22 = vld [vmem:[%s2039_s30 + $0x60] sm:$0xff]  ;;  %v413_v23 = vmul.f32 1.442695, %v147_v18  ;;  %v150_v24 = vld [vmem:[%s2039_s30 + $0x68] sm:$0xff]  ;;  %v415_v25 = vmul.f32 1.442695, %v148_v20 }
  0x3c   : > { %1322 = vpow2.f32 %v401_v10  ;;  %v151_v26 = vld [vmem:[%s2039_s30 + $0x70] sm:$0xff]  ;;  %v417_v27 = vmul.f32 1.442695, %v149_v22  ;;  %v152_v28 = vld [vmem:[%s2039_s30 + $0x78] sm:$0xff]  ;;  %v419_v29 = vmul.f32 1.442695, %v150_v24 }
  0x3d   : > { %1324 = vpow2.f32 %v403_v11  ;;  %v153_v30 = vld [vmem:[%s2039_s30 + $0x80] sm:$0xff]  ;;  %v421_v31 = vmul.f32 1.442695, %v151_v26  ;;  %v154_v32 = vld [vmem:[%s2039_s30 + $0x88] sm:$0xff]  ;;  %v423_v33 = vmul.f32 1.442695, %v152_v28 }
  0x3e   : > { %1326 = vpow2.f32 %v405_v15  ;;  %v155_v34 = vld [vmem:[%s2039_s30 + $0x90] sm:$0xff]  ;;  %v425_v35 = vmul.f32 1.442695, %v153_v30  ;;  %v156_v36 = vld [vmem:[%s2039_s30 + $0x98] sm:$0xff]  ;;  %v427_v38 = vmul.f32 1.442695, %v154_v32 }
  0x3f   : > { %1328 = vpow2.f32 %v407_v16  ;;  %v157_v39 = vld [vmem:[%s2039_s30 + $0xa0] sm:$0xff]  ;;  %v429_v41 = vmul.f32 1.442695, %v155_v34  ;;  %v158_v42 = vld [vmem:[%s2039_s30 + $0xa8] sm:$0xff]  ;;  %v431_v44 = vmul.f32 1.442695, %v156_v36 }
  0x40   : > { %1330 = vpow2.f32 %v409_v19  ;;  %v159_v45 = vld [vmem:[%s2039_s30 + $0xb0] sm:$0xff]  ;;  %v433_v47 = vmul.f32 1.442695, %v157_v39  ;;  %v160_v48 = vld [vmem:[%s2039_s30 + $0xb8] sm:$0xff]  ;;  %v435_v50 = vmul.f32 1.442695, %v158_v42 }
  0x41   : > { %1332 = vpow2.f32 %v411_v21  ;;  %v161_v51 = vld [vmem:[%s2039_s30 + $0xc0] sm:$0xff]  ;;  %v437_v53 = vmul.f32 1.442695, %v159_v45  ;;  %v162_v54 = vld [vmem:[%s2039_s30 + $0xc8] sm:$0xff]  ;;  %v439_v56 = vmul.f32 1.442695, %v160_v48 }
  0x42   : > { %1334 = vpow2.f32 %v413_v23  ;;  %v163_v57 = vld [vmem:[%s2039_s30 + $0xd0] sm:$0xff]  ;;  %v441_v59 = vmul.f32 1.442695, %v161_v51  ;;  %v164_v60 = vld [vmem:[%s2039_s30 + $0xd8] sm:$0xff]  ;;  %v443_v62 = vmul.f32 1.442695, %v162_v54 }
  0x43   : > { %1336 = vpow2.f32 %v415_v25  ;;  %v165_v63 = vld [vmem:[%s2039_s30 + $0xe0] sm:$0xff]  ;;  %v445_v1 = vmul.f32 1.442695, %v163_v57  ;;  %v166_v2 = vld [vmem:[%s2039_s30 + $0xe8] sm:$0xff]  ;;  %v447_v4 = vmul.f32 1.442695, %v164_v60 }
  0x44   : > { %1338 = vpow2.f32 %v417_v27  ;;  %v167_v5 = vld [vmem:[%s2039_s30 + $0xf0] sm:$0xff]  ;;  %v449_v7 = vmul.f32 1.442695, %v165_v63  ;;  %v168_v8 = vld [vmem:[%s2039_s30 + $0xf8] sm:$0xff]  ;;  %v451_v10 = vmul.f32 1.442695, %v166_v2 }
  0x45   : > { %v1315_v37 = vpop.eup %1314  ;;  %1340 = vpow2.f32 %v419_v29  ;;  %v169_v11 = vld [vmem:[%s2039_s30 + $0x100] sm:$0xff]  ;;  %v453_v13 = vmul.f32 1.442695, %v167_v5  ;;  %v170_v14 = vld [vmem:[%s2039_s30 + $0x108] sm:$0xff]  ;;  %v455_v16 = vmul.f32 1.442695, %v168_v8 }
  0x46   : > { %v1317_v40 = vpop.eup %1316  ;;  %905 = vst [vmem:[%s2068_s17] sm:$0xff] %v1315_v37  ;;  %1342 = vpow2.f32 %v421_v31  ;;  %v171_v17 = vld [vmem:[%s2039_s30 + $0x110] sm:$0xff]  ;;  %v457_v19 = vmul.f32 1.442695, %v169_v11  ;;  %v172_v20 = vld [vmem:[%s2039_s30 + $0x118] sm:$0xff]  ;;  %v459_v22 = vmul.f32 1.442695, %v170_v14 }
  0x47   : > { %v1319_v43 = vpop.eup %1318  ;;  %906 = vst [vmem:[%s2068_s17 + $0x8] sm:$0xff] %v1317_v40  ;;  %1344 = vpow2.f32 %v423_v33  ;;  %v173_v23 = vld [vmem:[%s2039_s30 + $0x120] sm:$0xff]  ;;  %v461_v25 = vmul.f32 1.442695, %v171_v17  ;;  %v174_v26 = vld [vmem:[%s2039_s30 + $0x128] sm:$0xff]  ;;  %v175_v29 = vld [vmem:[%s2039_s30 + $0x130] sm:$0xff] }
  0x48   : > { %v1321_v46 = vpop.eup %1320  ;;  %907 = vst [vmem:[%s2068_s17 + $0x10] sm:$0xff] %v1319_v43  ;;  %1346 = vpow2.f32 %v425_v35  ;;  %v463_v28 = vmul.f32 1.442695, %v172_v20  ;;  %v465_v31 = vmul.f32 1.442695, %v173_v23  ;;  %v176_v32 = vld [vmem:[%s2039_s30 + $0x138] sm:$0xff] }
  0x49   : > { %v1323_v49 = vpop.eup %1322  ;;  %908 = vst [vmem:[%s2068_s17 + $0x18] sm:$0xff] %v1321_v46  ;;  %1348 = vpow2.f32 %v427_v38  ;;  %v467_v34 = vmul.f32 1.442695, %v174_v26  ;;  %v177_v35 = vld [vmem:[%s2039_s30 + $0x140] sm:$0xff]  ;;  %v469_v37 = vmul.f32 1.442695, %v175_v29 }
  0x4a   : > { %v1325_v52 = vpop.eup %1324  ;;  %909 = vst [vmem:[%s2068_s17 + $0x20] sm:$0xff] %v1323_v49  ;;  %1350 = vpow2.f32 %v429_v41  ;;  %v178_v38 = vld [vmem:[%s2039_s30 + $0x148] sm:$0xff]  ;;  %v471_v40 = vmul.f32 1.442695, %v176_v32  ;;  %v179_v41 = vld [vmem:[%s2039_s30 + $0x150] sm:$0xff]  ;;  %s1175_s27 = sshll.u32 %s2068_s17, 4  ;;  %s2566_s27 = int_to_ptr.vmem [resolvable:$true] %s1175_s27 }
  0x4b   : > { %v1327_v55 = vpop.eup %1326  ;;  %910 = vst [vmem:[%s2068_s17 + $0x28] sm:$0xff] %v1325_v52  ;;  %1352 = vpow2.f32 %v431_v44  ;;  %v473_v43 = vmul.f32 1.442695, %v177_v35  ;;  %v180_v44 = vld [vmem:[%s2039_s30 + $0x158] sm:$0xff]  ;;  %v475_v46 = vmul.f32 1.442695, %v178_v38 }
  0x4c   : > { %v1329_v58 = vpop.eup %1328  ;;  %911 = vst [vmem:[%s2068_s17 + $0x30] sm:$0xff] %v1327_v55  ;;  %1354 = vpow2.f32 %v433_v47  ;;  %v181_v47 = vld [vmem:[%s2039_s30 + $0x160] sm:$0xff]  ;;  %v477_v49 = vmul.f32 1.442695, %v179_v41  ;;  %v479_v52 = vmul.f32 1.442695, %v180_v44 }
  0x4d   : > { %v1331_v61 = vpop.eup %1330  ;;  %912 = vst [vmem:[%s2068_s17 + $0x38] sm:$0xff] %v1329_v58  ;;  %1356 = vpow2.f32 %v435_v50  ;;  %v182_v50 = vld [vmem:[%s2039_s30 + $0x168] sm:$0xff]  ;;  %v481_v55 = vmul.f32 1.442695, %v181_v47  ;;  %s1162_s10 = scalar_lea.sflag [#allocation4], %s2033_s23  ;;  %s1854_s3 = scalar_lea.vmem %s2566_s27, 32768 }
  0x4e   : > { %v1333_v0 = vpop.eup %1332  ;;  %913 = vst [vmem:[%s2068_s17 + $0x40] sm:$0xff] %v1331_v61  ;;  %1358 = vpow2.f32 %v437_v53  ;;  %v183_v53 = vld [vmem:[%s2039_s30 + $0x170] sm:$0xff]  ;;  %v483_v58 = vmul.f32 1.442695, %v182_v50  ;;  %p1855_p11 = scmp.ne.s32.totalorder %s2566_s27, %s1854_s3  ;;  %p2621_p12 = scmp.ne.s32.totalorder %s2617_s18, 0 }
  0x4f   : > { %v1335_v3 = vpop.eup %1334  ;;  %914 = vst [vmem:[%s2068_s17 + $0x48] sm:$0xff] %v1333_v0  ;;  %1360 = vpow2.f32 %v439_v56  ;;  %v184_v56 = vld [vmem:[%s2039_s30 + $0x178] sm:$0xff]  ;;  %v485_v61 = vmul.f32 1.442695, %v183_v53  ;;  %s1923_s4 = smov [#allocation5]  }
  0x50   : > { %v1337_v6 = vpop.eup %1336  ;;  %915 = vst [vmem:[%s2068_s17 + $0x50] sm:$0xff] %v1335_v3  ;;  %1362 = vpow2.f32 %v441_v59  ;;  %v185_v59 = vld [vmem:[%s2039_s30 + $0x180] sm:$0xff]  ;;  %v487_v0 = vmul.f32 1.442695, %v184_v56  ;;  %p1856_p13 = pnand %p1855_p11, %p2621_p12  ;;  %s1858_s5 = sshll.u32 %s1923_s4, 4  ;;  %s1859_s5 = int_to_ptr.vmem [resolvable:$false] %s1858_s5 }
  0x51   : > { %v1339_v9 = vpop.eup %1338  ;;  %916 = vst [vmem:[%s2068_s17 + $0x58] sm:$0xff] %v1337_v6  ;;  %1364 = vpow2.f32 %v443_v62  ;;  %v186_v62 = vld [vmem:[%s2039_s30 + $0x188] sm:$0xff]  ;;  %v489_v3 = vmul.f32 1.442695, %v185_v59  ;;  %s1860_s11 = scalar_lea.vmem %s1859_s5, 65536  ;;  %p1861_p5 = scmp.lt.s32.totalorder %s2566_s27, %s1859_s5 }
  0x52   : > { %v1341_v12 = vpop.eup %1340  ;;  %917 = vst [vmem:[%s2068_s17 + $0x60] sm:$0xff] %v1339_v9  ;;  %1366 = vpow2.f32 %v445_v1  ;;  %v187_v1 = vld [vmem:[%s2039_s30 + $0x190] sm:$0xff]  ;;  %v491_v6 = vmul.f32 1.442695, %v186_v62  ;;  %p1857_p4 = pneg %p1856_p13  ;;  %p1862_p7 = scmp.lt.s32.totalorder %s1860_s11, %s1854_s3 }
  0x53   : > { %v1343_v15 = vpop.eup %1342  ;;  %918 = vst [vmem:[%s2068_s17 + $0x68] sm:$0xff] %v1341_v12  ;;  %1368 = vpow2.f32 %v447_v4  ;;  %v188_v4 = vld [vmem:[%s2039_s30 + $0x198] sm:$0xff]  ;;  %v493_v9 = vmul.f32 1.442695, %v187_v1 }
  0x54   : > { %v1345_v18 = vpop.eup %1344  ;;  %919 = vst [vmem:[%s2068_s17 + $0x70] sm:$0xff] %v1343_v15  ;;  %1370 = vpow2.f32 %v449_v7  ;;  %v189_v7 = vld [vmem:[%s2039_s30 + $0x1a0] sm:$0xff]  ;;  %v495_v12 = vmul.f32 1.442695, %v188_v4  ;;  %p1863_p8 = por %p1862_p7, %p1861_p5 }
  0x55   : > { %v1347_v21 = vpop.eup %1346  ;;  %920 = vst [vmem:[%s2068_s17 + $0x78] sm:$0xff] %v1345_v18  ;;  %1372 = vpow2.f32 %v451_v10  ;;  %v190_v10 = vld [vmem:[%s2039_s30 + $0x1a8] sm:$0xff]  ;;  %v497_v15 = vmul.f32 1.442695, %v189_v7 }
  0x56   : > { %v1349_v24 = vpop.eup %1348  ;;  %921 = vst [vmem:[%s2068_s17 + $0x80] sm:$0xff] %v1347_v21  ;;  %1374 = vpow2.f32 %v453_v13  ;;  %v191_v13 = vld [vmem:[%s2039_s30 + $0x1b0] sm:$0xff]  ;;  %v499_v18 = vmul.f32 1.442695, %v190_v10  ;;  %p1864_p10 = pnand %p1863_p8, %p1857_p4 }
  0x57   : > { %v1351_v27 = vpop.eup %1350  ;;  %922 = vst [vmem:[%s2068_s17 + $0x88] sm:$0xff] %v1349_v24  ;;  %1376 = vpow2.f32 %v455_v16  ;;  %v192_v16 = vld [vmem:[%s2039_s30 + $0x1b8] sm:$0xff]  ;;  %v501_v21 = vmul.f32 1.442695, %v191_v13 }
  0x58   : > { %v1353_v30 = vpop.eup %1352  ;;  %923 = vst [vmem:[%s2068_s17 + $0x90] sm:$0xff] %v1351_v27  ;;  %1378 = vpow2.f32 %v457_v19  ;;  %v193_v19 = vld [vmem:[%s2039_s30 + $0x1c0] sm:$0xff]  ;;  %v503_v24 = vmul.f32 1.442695, %v192_v16 }
  0x59   : > { %v1355_v33 = vpop.eup %1354  ;;  %924 = vst [vmem:[%s2068_s17 + $0x98] sm:$0xff] %v1353_v30  ;;  %1380 = vpow2.f32 %v459_v22  ;;  %v194_v22 = vld [vmem:[%s2039_s30 + $0x1c8] sm:$0xff]  ;;  %v505_v27 = vmul.f32 1.442695, %v193_v19 }
  0x5a   : > { %v1357_v36 = vpop.eup %1356  ;;  %925 = vst [vmem:[%s2068_s17 + $0xa0] sm:$0xff] %v1355_v33  ;;  %1382 = vpow2.f32 %v461_v25  ;;  %v195_v25 = vld [vmem:[%s2039_s30 + $0x1d0] sm:$0xff]  ;;  %v507_v30 = vmul.f32 1.442695, %v194_v22 }
  0x5b   : > { %v1359_v39 = vpop.eup %1358  ;;  %926 = vst [vmem:[%s2068_s17 + $0xa8] sm:$0xff] %v1357_v36  ;;  %1384 = vpow2.f32 %v463_v28  ;;  %v196_v28 = vld [vmem:[%s2039_s30 + $0x1d8] sm:$0xff]  ;;  %v509_v33 = vmul.f32 1.442695, %v195_v25 }
  0x5c   : > { %v1361_v42 = vpop.eup %1360  ;;  %927 = vst [vmem:[%s2068_s17 + $0xb0] sm:$0xff] %v1359_v39  ;;  %1386 = vpow2.f32 %v465_v31  ;;  %v197_v31 = vld [vmem:[%s2039_s30 + $0x1e0] sm:$0xff]  ;;  %v511_v36 = vmul.f32 1.442695, %v196_v28 }
  0x5d   : > { %v1363_v45 = vpop.eup %1362  ;;  %928 = vst [vmem:[%s2068_s17 + $0xb8] sm:$0xff] %v1361_v42  ;;  %1388 = vpow2.f32 %v467_v34  ;;  %v198_v34 = vld [vmem:[%s2039_s30 + $0x1e8] sm:$0xff]  ;;  %v513_v39 = vmul.f32 1.442695, %v197_v31 }
  0x5e   : > { %v1365_v48 = vpop.eup %1364  ;;  %929 = vst [vmem:[%s2068_s17 + $0xc0] sm:$0xff] %v1363_v45  ;;  %1390 = vpow2.f32 %v469_v37  ;;  %v199_v37 = vld [vmem:[%s2039_s30 + $0x1f0] sm:$0xff]  ;;  %v515_v42 = vmul.f32 1.442695, %v198_v34 }
  0x5f   : > { %v1367_v51 = vpop.eup %1366  ;;  %930 = vst [vmem:[%s2068_s17 + $0xc8] sm:$0xff] %v1365_v48  ;;  %1392 = vpow2.f32 %v471_v40  ;;  %v200_v40 = vld [vmem:[%s2039_s30 + $0x1f8] sm:$0xff]  ;;  %v517_v45 = vmul.f32 1.442695, %v199_v37 }
  0x60   : > { %v1369_v54 = vpop.eup %1368  ;;  %931 = vst [vmem:[%s2068_s17 + $0xd0] sm:$0xff] %v1367_v51  ;;  %1394 = vpow2.f32 %v473_v43  ;;  %v201_v43 = vld [vmem:[%s2039_s30 + $0x200] sm:$0xff]  ;;  %v519_v48 = vmul.f32 1.442695, %v200_v40 }
  0x61   : > { %v1371_v57 = vpop.eup %1370  ;;  %932 = vst [vmem:[%s2068_s17 + $0xd8] sm:$0xff] %v1369_v54  ;;  %1396 = vpow2.f32 %v475_v46  ;;  %v202_v46 = vld [vmem:[%s2039_s30 + $0x208] sm:$0xff]  ;;  %v521_v51 = vmul.f32 1.442695, %v201_v43 }
  0x62   : > { %v1373_v60 = vpop.eup %1372  ;;  %933 = vst [vmem:[%s2068_s17 + $0xe0] sm:$0xff] %v1371_v57  ;;  %1398 = vpow2.f32 %v477_v49  ;;  %v203_v49 = vld [vmem:[%s2039_s30 + $0x210] sm:$0xff]  ;;  %v523_v54 = vmul.f32 1.442695, %v202_v46 }
  0x63   : > { %v1375_v63 = vpop.eup %1374  ;;  %934 = vst [vmem:[%s2068_s17 + $0xe8] sm:$0xff] %v1373_v60  ;;  %1400 = vpow2.f32 %v479_v52  ;;  %v204_v52 = vld [vmem:[%s2039_s30 + $0x218] sm:$0xff]  ;;  %v525_v57 = vmul.f32 1.442695, %v203_v49 }
  0x64   : > { %v1377_v2 = vpop.eup %1376  ;;  %935 = vst [vmem:[%s2068_s17 + $0xf0] sm:$0xff] %v1375_v63  ;;  %1402 = vpow2.f32 %v481_v55  ;;  %v205_v55 = vld [vmem:[%s2039_s30 + $0x220] sm:$0xff]  ;;  %v527_v60 = vmul.f32 1.442695, %v204_v52 }
  0x65   : > { %v1379_v5 = vpop.eup %1378  ;;  %936 = vst [vmem:[%s2068_s17 + $0xf8] sm:$0xff] %v1377_v2  ;;  %1404 = vpow2.f32 %v483_v58  ;;  %v206_v58 = vld [vmem:[%s2039_s30 + $0x228] sm:$0xff]  ;;  %v529_v63 = vmul.f32 1.442695, %v205_v55 }
  0x66   : > { %v1381_v8 = vpop.eup %1380  ;;  %937 = vst [vmem:[%s2068_s17 + $0x100] sm:$0xff] %v1379_v5  ;;  %1406 = vpow2.f32 %v485_v61  ;;  %v207_v61 = vld [vmem:[%s2039_s30 + $0x230] sm:$0xff]  ;;  %v531_v2 = vmul.f32 1.442695, %v206_v58 }
  0x67   : > { %v1383_v11 = vpop.eup %1382  ;;  %938 = vst [vmem:[%s2068_s17 + $0x108] sm:$0xff] %v1381_v8  ;;  %1408 = vpow2.f32 %v487_v0  ;;  %v208_v0 = vld [vmem:[%s2039_s30 + $0x238] sm:$0xff]  ;;  %v533_v5 = vmul.f32 1.442695, %v207_v61 }
  0x68   : > { %v1385_v14 = vpop.eup %1384  ;;  %939 = vst [vmem:[%s2068_s17 + $0x110] sm:$0xff] %v1383_v11  ;;  %1410 = vpow2.f32 %v489_v3  ;;  %v209_v3 = vld [vmem:[%s2039_s30 + $0x240] sm:$0xff]  ;;  %v535_v8 = vmul.f32 1.442695, %v208_v0 }
  0x69   : > { %v1387_v17 = vpop.eup %1386  ;;  %940 = vst [vmem:[%s2068_s17 + $0x118] sm:$0xff] %v1385_v14  ;;  %1412 = vpow2.f32 %v491_v6  ;;  %v210_v6 = vld [vmem:[%s2039_s30 + $0x248] sm:$0xff]  ;;  %v537_v11 = vmul.f32 1.442695, %v209_v3 }
  0x6a   : > { %v1389_v20 = vpop.eup %1388  ;;  %941 = vst [vmem:[%s2068_s17 + $0x120] sm:$0xff] %v1387_v17  ;;  %1414 = vpow2.f32 %v493_v9  ;;  %v211_v9 = vld [vmem:[%s2039_s30 + $0x250] sm:$0xff]  ;;  %v539_v14 = vmul.f32 1.442695, %v210_v6 }
  0x6b   : > { %v1391_v23 = vpop.eup %1390  ;;  %942 = vst [vmem:[%s2068_s17 + $0x128] sm:$0xff] %v1389_v20  ;;  %1416 = vpow2.f32 %v495_v12  ;;  %v212_v12 = vld [vmem:[%s2039_s30 + $0x258] sm:$0xff]  ;;  %v541_v17 = vmul.f32 1.442695, %v211_v9 }
  0x6c   : > { %v1393_v26 = vpop.eup %1392  ;;  %943 = vst [vmem:[%s2068_s17 + $0x130] sm:$0xff] %v1391_v23  ;;  %1418 = vpow2.f32 %v497_v15  ;;  %v213_v15 = vld [vmem:[%s2039_s30 + $0x260] sm:$0xff]  ;;  %v543_v20 = vmul.f32 1.442695, %v212_v12 }
  0x6d   : > { %v1395_v29 = vpop.eup %1394  ;;  %944 = vst [vmem:[%s2068_s17 + $0x138] sm:$0xff] %v1393_v26  ;;  %1420 = vpow2.f32 %v499_v18  ;;  %v214_v18 = vld [vmem:[%s2039_s30 + $0x268] sm:$0xff]  ;;  %v545_v23 = vmul.f32 1.442695, %v213_v15 }
  0x6e   : > { %v1397_v32 = vpop.eup %1396  ;;  %945 = vst [vmem:[%s2068_s17 + $0x140] sm:$0xff] %v1395_v29  ;;  %1422 = vpow2.f32 %v501_v21  ;;  %v215_v21 = vld [vmem:[%s2039_s30 + $0x270] sm:$0xff]  ;;  %v547_v26 = vmul.f32 1.442695, %v214_v18 }
  0x6f   : > { %v1399_v35 = vpop.eup %1398  ;;  %946 = vst [vmem:[%s2068_s17 + $0x148] sm:$0xff] %v1397_v32  ;;  %1424 = vpow2.f32 %v503_v24  ;;  %v216_v24 = vld [vmem:[%s2039_s30 + $0x278] sm:$0xff]  ;;  %v549_v29 = vmul.f32 1.442695, %v215_v21 }
  0x70   : > { %v1401_v38 = vpop.eup %1400  ;;  %947 = vst [vmem:[%s2068_s17 + $0x150] sm:$0xff] %v1399_v35  ;;  %1426 = vpow2.f32 %v505_v27  ;;  %v217_v27 = vld [vmem:[%s2039_s30 + $0x280] sm:$0xff]  ;;  %v551_v32 = vmul.f32 1.442695, %v216_v24 }
  0x71   : > { %v1403_v41 = vpop.eup %1402  ;;  %948 = vst [vmem:[%s2068_s17 + $0x158] sm:$0xff] %v1401_v38  ;;  %1428 = vpow2.f32 %v507_v30  ;;  %v218_v30 = vld [vmem:[%s2039_s30 + $0x288] sm:$0xff]  ;;  %v553_v35 = vmul.f32 1.442695, %v217_v27 }
  0x72   : > { %v1405_v44 = vpop.eup %1404  ;;  %949 = vst [vmem:[%s2068_s17 + $0x160] sm:$0xff] %v1403_v41  ;;  %1430 = vpow2.f32 %v509_v33  ;;  %v219_v33 = vld [vmem:[%s2039_s30 + $0x290] sm:$0xff]  ;;  %v555_v38 = vmul.f32 1.442695, %v218_v30 }
  0x73   : > { %v1407_v47 = vpop.eup %1406  ;;  %950 = vst [vmem:[%s2068_s17 + $0x168] sm:$0xff] %v1405_v44  ;;  %1432 = vpow2.f32 %v511_v36  ;;  %v220_v36 = vld [vmem:[%s2039_s30 + $0x298] sm:$0xff]  ;;  %v557_v41 = vmul.f32 1.442695, %v219_v33 }
  0x74   : > { %v1409_v50 = vpop.eup %1408  ;;  %951 = vst [vmem:[%s2068_s17 + $0x170] sm:$0xff] %v1407_v47  ;;  %1434 = vpow2.f32 %v513_v39  ;;  %v221_v39 = vld [vmem:[%s2039_s30 + $0x2a0] sm:$0xff]  ;;  %v559_v44 = vmul.f32 1.442695, %v220_v36 }
  0x75   : > { %v1411_v53 = vpop.eup %1410  ;;  %952 = vst [vmem:[%s2068_s17 + $0x178] sm:$0xff] %v1409_v50  ;;  %1436 = vpow2.f32 %v515_v42  ;;  %v222_v42 = vld [vmem:[%s2039_s30 + $0x2a8] sm:$0xff]  ;;  %v561_v47 = vmul.f32 1.442695, %v221_v39 }
  0x76   : > { %v1413_v56 = vpop.eup %1412  ;;  %953 = vst [vmem:[%s2068_s17 + $0x180] sm:$0xff] %v1411_v53  ;;  %1438 = vpow2.f32 %v517_v45  ;;  %v223_v45 = vld [vmem:[%s2039_s30 + $0x2b0] sm:$0xff]  ;;  %v563_v50 = vmul.f32 1.442695, %v222_v42 }
  0x77   : > { %v1415_v59 = vpop.eup %1414  ;;  %954 = vst [vmem:[%s2068_s17 + $0x188] sm:$0xff] %v1413_v56  ;;  %1440 = vpow2.f32 %v519_v48  ;;  %v224_v48 = vld [vmem:[%s2039_s30 + $0x2b8] sm:$0xff]  ;;  %v565_v53 = vmul.f32 1.442695, %v223_v45 }
  0x78   : > { %v1417_v62 = vpop.eup %1416  ;;  %955 = vst [vmem:[%s2068_s17 + $0x190] sm:$0xff] %v1415_v59  ;;  %1442 = vpow2.f32 %v521_v51  ;;  %v225_v51 = vld [vmem:[%s2039_s30 + $0x2c0] sm:$0xff]  ;;  %v567_v56 = vmul.f32 1.442695, %v224_v48 }
  0x79   : > { %v1419_v1 = vpop.eup %1418  ;;  %956 = vst [vmem:[%s2068_s17 + $0x198] sm:$0xff] %v1417_v62  ;;  %1444 = vpow2.f32 %v523_v54  ;;  %v226_v54 = vld [vmem:[%s2039_s30 + $0x2c8] sm:$0xff]  ;;  %v569_v59 = vmul.f32 1.442695, %v225_v51 }
  0x7a   : > { %v1421_v4 = vpop.eup %1420  ;;  %957 = vst [vmem:[%s2068_s17 + $0x1a0] sm:$0xff] %v1419_v1  ;;  %1446 = vpow2.f32 %v525_v57  ;;  %v227_v57 = vld [vmem:[%s2039_s30 + $0x2d0] sm:$0xff]  ;;  %v571_v62 = vmul.f32 1.442695, %v226_v54 }
  0x7b   : > { %v1423_v7 = vpop.eup %1422  ;;  %958 = vst [vmem:[%s2068_s17 + $0x1a8] sm:$0xff] %v1421_v4  ;;  %1448 = vpow2.f32 %v527_v60  ;;  %v228_v60 = vld [vmem:[%s2039_s30 + $0x2d8] sm:$0xff]  ;;  %v573_v1 = vmul.f32 1.442695, %v227_v57 }
  0x7c   : > { %v1425_v10 = vpop.eup %1424  ;;  %959 = vst [vmem:[%s2068_s17 + $0x1b0] sm:$0xff] %v1423_v7  ;;  %1450 = vpow2.f32 %v529_v63  ;;  %v229_v63 = vld [vmem:[%s2039_s30 + $0x2e0] sm:$0xff]  ;;  %v575_v4 = vmul.f32 1.442695, %v228_v60 }
  0x7d   : > { %v1427_v13 = vpop.eup %1426  ;;  %960 = vst [vmem:[%s2068_s17 + $0x1b8] sm:$0xff] %v1425_v10  ;;  %1452 = vpow2.f32 %v531_v2  ;;  %v230_v2 = vld [vmem:[%s2039_s30 + $0x2e8] sm:$0xff]  ;;  %v577_v7 = vmul.f32 1.442695, %v229_v63 }
  0x7e   : > { %v1429_v16 = vpop.eup %1428  ;;  %961 = vst [vmem:[%s2068_s17 + $0x1c0] sm:$0xff] %v1427_v13  ;;  %1454 = vpow2.f32 %v533_v5  ;;  %v231_v5 = vld [vmem:[%s2039_s30 + $0x2f0] sm:$0xff]  ;;  %v579_v10 = vmul.f32 1.442695, %v230_v2 }
  0x7f   : > { %v1431_v19 = vpop.eup %1430  ;;  %962 = vst [vmem:[%s2068_s17 + $0x1c8] sm:$0xff] %v1429_v16  ;;  %1456 = vpow2.f32 %v535_v8  ;;  %v232_v8 = vld [vmem:[%s2039_s30 + $0x2f8] sm:$0xff]  ;;  %v581_v13 = vmul.f32 1.442695, %v231_v5 }
  0x80   : > { %v1433_v22 = vpop.eup %1432  ;;  %963 = vst [vmem:[%s2068_s17 + $0x1d0] sm:$0xff] %v1431_v19  ;;  %1458 = vpow2.f32 %v537_v11  ;;  %v233_v11 = vld [vmem:[%s2039_s30 + $0x300] sm:$0xff]  ;;  %v583_v16 = vmul.f32 1.442695, %v232_v8 }
  0x81   : > { %v1435_v25 = vpop.eup %1434  ;;  %964 = vst [vmem:[%s2068_s17 + $0x1d8] sm:$0xff] %v1433_v22  ;;  %1460 = vpow2.f32 %v539_v14  ;;  %v234_v14 = vld [vmem:[%s2039_s30 + $0x308] sm:$0xff]  ;;  %v585_v19 = vmul.f32 1.442695, %v233_v11 }
  0x82   : > { %v1437_v28 = vpop.eup %1436  ;;  %965 = vst [vmem:[%s2068_s17 + $0x1e0] sm:$0xff] %v1435_v25  ;;  %1462 = vpow2.f32 %v541_v17  ;;  %v235_v17 = vld [vmem:[%s2039_s30 + $0x310] sm:$0xff]  ;;  %v587_v22 = vmul.f32 1.442695, %v234_v14 }
  0x83   : > { %v1439_v31 = vpop.eup %1438  ;;  %966 = vst [vmem:[%s2068_s17 + $0x1e8] sm:$0xff] %v1437_v28  ;;  %1464 = vpow2.f32 %v543_v20  ;;  %v236_v20 = vld [vmem:[%s2039_s30 + $0x318] sm:$0xff]  ;;  %v589_v25 = vmul.f32 1.442695, %v235_v17 }
  0x84   : > { %v1441_v34 = vpop.eup %1440  ;;  %967 = vst [vmem:[%s2068_s17 + $0x1f0] sm:$0xff] %v1439_v31  ;;  %1466 = vpow2.f32 %v545_v23  ;;  %v237_v23 = vld [vmem:[%s2039_s30 + $0x320] sm:$0xff]  ;;  %v591_v28 = vmul.f32 1.442695, %v236_v20 }
  0x85   : > { %v1443_v37 = vpop.eup %1442  ;;  %968 = vst [vmem:[%s2068_s17 + $0x1f8] sm:$0xff] %v1441_v34  ;;  %1468 = vpow2.f32 %v547_v26  ;;  %v238_v26 = vld [vmem:[%s2039_s30 + $0x328] sm:$0xff]  ;;  %v593_v31 = vmul.f32 1.442695, %v237_v23 }
  0x86   : > { %v1445_v40 = vpop.eup %1444  ;;  %969 = vst [vmem:[%s2068_s17 + $0x200] sm:$0xff] %v1443_v37  ;;  %1470 = vpow2.f32 %v549_v29  ;;  %v239_v29 = vld [vmem:[%s2039_s30 + $0x330] sm:$0xff]  ;;  %v595_v34 = vmul.f32 1.442695, %v238_v26 }
  0x87   : > { %v1447_v43 = vpop.eup %1446  ;;  %970 = vst [vmem:[%s2068_s17 + $0x208] sm:$0xff] %v1445_v40  ;;  %1472 = vpow2.f32 %v551_v32  ;;  %v240_v32 = vld [vmem:[%s2039_s30 + $0x338] sm:$0xff]  ;;  %v597_v37 = vmul.f32 1.442695, %v239_v29 }
  0x88   : > { %v1449_v46 = vpop.eup %1448  ;;  %971 = vst [vmem:[%s2068_s17 + $0x210] sm:$0xff] %v1447_v43  ;;  %1474 = vpow2.f32 %v553_v35  ;;  %v241_v35 = vld [vmem:[%s2039_s30 + $0x340] sm:$0xff]  ;;  %v599_v40 = vmul.f32 1.442695, %v240_v32 }
  0x89   : > { %v1451_v49 = vpop.eup %1450  ;;  %972 = vst [vmem:[%s2068_s17 + $0x218] sm:$0xff] %v1449_v46  ;;  %1476 = vpow2.f32 %v555_v38  ;;  %v242_v38 = vld [vmem:[%s2039_s30 + $0x348] sm:$0xff]  ;;  %v601_v43 = vmul.f32 1.442695, %v241_v35 }
  0x8a   : > { %v1453_v52 = vpop.eup %1452  ;;  %973 = vst [vmem:[%s2068_s17 + $0x220] sm:$0xff] %v1451_v49  ;;  %1478 = vpow2.f32 %v557_v41  ;;  %v243_v41 = vld [vmem:[%s2039_s30 + $0x350] sm:$0xff]  ;;  %v603_v46 = vmul.f32 1.442695, %v242_v38 }
  0x8b   : > { %v1455_v55 = vpop.eup %1454  ;;  %974 = vst [vmem:[%s2068_s17 + $0x228] sm:$0xff] %v1453_v52  ;;  %1480 = vpow2.f32 %v559_v44  ;;  %v244_v44 = vld [vmem:[%s2039_s30 + $0x358] sm:$0xff]  ;;  %v605_v49 = vmul.f32 1.442695, %v243_v41 }
  0x8c   : > { %v1457_v58 = vpop.eup %1456  ;;  %975 = vst [vmem:[%s2068_s17 + $0x230] sm:$0xff] %v1455_v55  ;;  %1482 = vpow2.f32 %v561_v47  ;;  %v245_v47 = vld [vmem:[%s2039_s30 + $0x360] sm:$0xff]  ;;  %v607_v52 = vmul.f32 1.442695, %v244_v44 }
  0x8d   : > { %v1459_v61 = vpop.eup %1458  ;;  %976 = vst [vmem:[%s2068_s17 + $0x238] sm:$0xff] %v1457_v58  ;;  %1484 = vpow2.f32 %v563_v50  ;;  %v246_v50 = vld [vmem:[%s2039_s30 + $0x368] sm:$0xff]  ;;  %v609_v55 = vmul.f32 1.442695, %v245_v47 }
  0x8e   : > { %v1461_v0 = vpop.eup %1460  ;;  %977 = vst [vmem:[%s2068_s17 + $0x240] sm:$0xff] %v1459_v61  ;;  %1486 = vpow2.f32 %v565_v53  ;;  %v247_v53 = vld [vmem:[%s2039_s30 + $0x370] sm:$0xff]  ;;  %v611_v58 = vmul.f32 1.442695, %v246_v50 }
  0x8f   : > { %v1463_v3 = vpop.eup %1462  ;;  %978 = vst [vmem:[%s2068_s17 + $0x248] sm:$0xff] %v1461_v0  ;;  %1488 = vpow2.f32 %v567_v56  ;;  %v248_v56 = vld [vmem:[%s2039_s30 + $0x378] sm:$0xff]  ;;  %v613_v61 = vmul.f32 1.442695, %v247_v53 }
  0x90   : > { %v1465_v6 = vpop.eup %1464  ;;  %979 = vst [vmem:[%s2068_s17 + $0x250] sm:$0xff] %v1463_v3  ;;  %1490 = vpow2.f32 %v569_v59  ;;  %v249_v59 = vld [vmem:[%s2039_s30 + $0x380] sm:$0xff]  ;;  %v615_v0 = vmul.f32 1.442695, %v248_v56 }
  0x91   : > { %v1467_v9 = vpop.eup %1466  ;;  %980 = vst [vmem:[%s2068_s17 + $0x258] sm:$0xff] %v1465_v6  ;;  %1492 = vpow2.f32 %v571_v62  ;;  %v250_v62 = vld [vmem:[%s2039_s30 + $0x388] sm:$0xff]  ;;  %v617_v3 = vmul.f32 1.442695, %v249_v59 }
  0x92   : > { %v1469_v12 = vpop.eup %1468  ;;  %981 = vst [vmem:[%s2068_s17 + $0x260] sm:$0xff] %v1467_v9  ;;  %1494 = vpow2.f32 %v573_v1  ;;  %v251_v1 = vld [vmem:[%s2039_s30 + $0x390] sm:$0xff]  ;;  %v619_v6 = vmul.f32 1.442695, %v250_v62 }
  0x93   : > { %v1471_v15 = vpop.eup %1470  ;;  %982 = vst [vmem:[%s2068_s17 + $0x268] sm:$0xff] %v1469_v12  ;;  %1496 = vpow2.f32 %v575_v4  ;;  %v252_v4 = vld [vmem:[%s2039_s30 + $0x398] sm:$0xff]  ;;  %v621_v9 = vmul.f32 1.442695, %v251_v1 }
  0x94   : > { %v1473_v18 = vpop.eup %1472  ;;  %983 = vst [vmem:[%s2068_s17 + $0x270] sm:$0xff] %v1471_v15  ;;  %1498 = vpow2.f32 %v577_v7  ;;  %v253_v7 = vld [vmem:[%s2039_s30 + $0x3a0] sm:$0xff]  ;;  %v623_v12 = vmul.f32 1.442695, %v252_v4 }
  0x95   : > { %v1475_v21 = vpop.eup %1474  ;;  %984 = vst [vmem:[%s2068_s17 + $0x278] sm:$0xff] %v1473_v18  ;;  %1500 = vpow2.f32 %v579_v10  ;;  %v254_v10 = vld [vmem:[%s2039_s30 + $0x3a8] sm:$0xff]  ;;  %v625_v15 = vmul.f32 1.442695, %v253_v7 }
  0x96   : > { %v1477_v24 = vpop.eup %1476  ;;  %985 = vst [vmem:[%s2068_s17 + $0x280] sm:$0xff] %v1475_v21  ;;  %1502 = vpow2.f32 %v581_v13  ;;  %v255_v13 = vld [vmem:[%s2039_s30 + $0x3b0] sm:$0xff]  ;;  %v627_v18 = vmul.f32 1.442695, %v254_v10 }
  0x97   : > { %v1479_v27 = vpop.eup %1478  ;;  %986 = vst [vmem:[%s2068_s17 + $0x288] sm:$0xff] %v1477_v24  ;;  %1504 = vpow2.f32 %v583_v16  ;;  %v256_v16 = vld [vmem:[%s2039_s30 + $0x3b8] sm:$0xff]  ;;  %v629_v21 = vmul.f32 1.442695, %v255_v13 }
  0x98   : > { %v1481_v30 = vpop.eup %1480  ;;  %987 = vst [vmem:[%s2068_s17 + $0x290] sm:$0xff] %v1479_v27  ;;  %1506 = vpow2.f32 %v585_v19  ;;  %v257_v19 = vld [vmem:[%s2039_s30 + $0x3c0] sm:$0xff]  ;;  %v631_v24 = vmul.f32 1.442695, %v256_v16 }
  0x99   : > { %v1483_v33 = vpop.eup %1482  ;;  %988 = vst [vmem:[%s2068_s17 + $0x298] sm:$0xff] %v1481_v30  ;;  %1508 = vpow2.f32 %v587_v22  ;;  %v258_v22 = vld [vmem:[%s2039_s30 + $0x3c8] sm:$0xff]  ;;  %v633_v27 = vmul.f32 1.442695, %v257_v19 }
  0x9a   : > { %v1485_v36 = vpop.eup %1484  ;;  %989 = vst [vmem:[%s2068_s17 + $0x2a0] sm:$0xff] %v1483_v33  ;;  %1510 = vpow2.f32 %v589_v25  ;;  %v259_v25 = vld [vmem:[%s2039_s30 + $0x3d0] sm:$0xff]  ;;  %v635_v30 = vmul.f32 1.442695, %v258_v22 }
  0x9b   : > { %v1487_v39 = vpop.eup %1486  ;;  %990 = vst [vmem:[%s2068_s17 + $0x2a8] sm:$0xff] %v1485_v36  ;;  %1512 = vpow2.f32 %v591_v28  ;;  %v260_v28 = vld [vmem:[%s2039_s30 + $0x3d8] sm:$0xff]  ;;  %v637_v33 = vmul.f32 1.442695, %v259_v25 }
  0x9c   : > { %v1489_v42 = vpop.eup %1488  ;;  %991 = vst [vmem:[%s2068_s17 + $0x2b0] sm:$0xff] %v1487_v39  ;;  %1514 = vpow2.f32 %v593_v31  ;;  %v261_v31 = vld [vmem:[%s2039_s30 + $0x3e0] sm:$0xff]  ;;  %v639_v36 = vmul.f32 1.442695, %v260_v28 }
  0x9d   : > { %v1491_v45 = vpop.eup %1490  ;;  %992 = vst [vmem:[%s2068_s17 + $0x2b8] sm:$0xff] %v1489_v42  ;;  %1516 = vpow2.f32 %v595_v34  ;;  %v262_v34 = vld [vmem:[%s2039_s30 + $0x3e8] sm:$0xff]  ;;  %v641_v39 = vmul.f32 1.442695, %v261_v31 }
  0x9e   : > { %v1493_v48 = vpop.eup %1492  ;;  %993 = vst [vmem:[%s2068_s17 + $0x2c0] sm:$0xff] %v1491_v45  ;;  %1518 = vpow2.f32 %v597_v37  ;;  %v263_v37 = vld [vmem:[%s2039_s30 + $0x3f0] sm:$0xff]  ;;  %v643_v42 = vmul.f32 1.442695, %v262_v34 }
  0x9f   : > { %v1495_v51 = vpop.eup %1494  ;;  %994 = vst [vmem:[%s2068_s17 + $0x2c8] sm:$0xff] %v1493_v48  ;;  %1520 = vpow2.f32 %v599_v40  ;;  %v264_v40 = vld [vmem:[%s2039_s30 + $0x3f8] sm:$0xff]  ;;  %v645_v45 = vmul.f32 1.442695, %v263_v37 }
  0xa0   : > { %v1497_v54 = vpop.eup %1496  ;;  %995 = vst [vmem:[%s2068_s17 + $0x2d0] sm:$0xff] %v1495_v51  ;;  %1522 = vpow2.f32 %v601_v43  ;;  %v265_v43 = vld [vmem:[%s2039_s30 + $0x400] sm:$0xff]  ;;  %v647_v48 = vmul.f32 1.442695, %v264_v40 }
  0xa1   : > { %v1499_v57 = vpop.eup %1498  ;;  %996 = vst [vmem:[%s2068_s17 + $0x2d8] sm:$0xff] %v1497_v54  ;;  %1524 = vpow2.f32 %v603_v46  ;;  %v266_v46 = vld [vmem:[%s2039_s30 + $0x408] sm:$0xff]  ;;  %v649_v51 = vmul.f32 1.442695, %v265_v43 }
  0xa2   : > { %v1501_v60 = vpop.eup %1500  ;;  %997 = vst [vmem:[%s2068_s17 + $0x2e0] sm:$0xff] %v1499_v57  ;;  %1526 = vpow2.f32 %v605_v49  ;;  %v267_v49 = vld [vmem:[%s2039_s30 + $0x410] sm:$0xff]  ;;  %v651_v54 = vmul.f32 1.442695, %v266_v46 }
  0xa3   : > { %v1503_v63 = vpop.eup %1502  ;;  %998 = vst [vmem:[%s2068_s17 + $0x2e8] sm:$0xff] %v1501_v60  ;;  %1528 = vpow2.f32 %v607_v52  ;;  %v268_v52 = vld [vmem:[%s2039_s30 + $0x418] sm:$0xff]  ;;  %v653_v57 = vmul.f32 1.442695, %v267_v49 }
  0xa4   : > { %v1505_v2 = vpop.eup %1504  ;;  %999 = vst [vmem:[%s2068_s17 + $0x2f0] sm:$0xff] %v1503_v63  ;;  %1530 = vpow2.f32 %v609_v55  ;;  %v269_v55 = vld [vmem:[%s2039_s30 + $0x420] sm:$0xff]  ;;  %v655_v60 = vmul.f32 1.442695, %v268_v52 }
  0xa5   : > { %v1507_v5 = vpop.eup %1506  ;;  %1000 = vst [vmem:[%s2068_s17 + $0x2f8] sm:$0xff] %v1505_v2  ;;  %1532 = vpow2.f32 %v611_v58  ;;  %v270_v58 = vld [vmem:[%s2039_s30 + $0x428] sm:$0xff]  ;;  %v657_v63 = vmul.f32 1.442695, %v269_v55 }
  0xa6   : > { %v1509_v8 = vpop.eup %1508  ;;  %1001 = vst [vmem:[%s2068_s17 + $0x300] sm:$0xff] %v1507_v5  ;;  %1534 = vpow2.f32 %v613_v61  ;;  %v271_v61 = vld [vmem:[%s2039_s30 + $0x430] sm:$0xff]  ;;  %v659_v2 = vmul.f32 1.442695, %v270_v58 }
  0xa7   : > { %v1511_v11 = vpop.eup %1510  ;;  %1002 = vst [vmem:[%s2068_s17 + $0x308] sm:$0xff] %v1509_v8  ;;  %1536 = vpow2.f32 %v615_v0  ;;  %v272_v0 = vld [vmem:[%s2039_s30 + $0x438] sm:$0xff]  ;;  %v661_v5 = vmul.f32 1.442695, %v271_v61 }
  0xa8   : > { %v1513_v14 = vpop.eup %1512  ;;  %1003 = vst [vmem:[%s2068_s17 + $0x310] sm:$0xff] %v1511_v11  ;;  %1538 = vpow2.f32 %v617_v3  ;;  %v273_v3 = vld [vmem:[%s2039_s30 + $0x440] sm:$0xff]  ;;  %v663_v8 = vmul.f32 1.442695, %v272_v0 }
  0xa9   : > { %v1515_v17 = vpop.eup %1514  ;;  %1004 = vst [vmem:[%s2068_s17 + $0x318] sm:$0xff] %v1513_v14  ;;  %1540 = vpow2.f32 %v619_v6  ;;  %v274_v6 = vld [vmem:[%s2039_s30 + $0x448] sm:$0xff]  ;;  %v665_v11 = vmul.f32 1.442695, %v273_v3 }
  0xaa   : > { %v1517_v20 = vpop.eup %1516  ;;  %1005 = vst [vmem:[%s2068_s17 + $0x320] sm:$0xff] %v1515_v17  ;;  %1542 = vpow2.f32 %v621_v9  ;;  %v275_v9 = vld [vmem:[%s2039_s30 + $0x450] sm:$0xff]  ;;  %v667_v14 = vmul.f32 1.442695, %v274_v6 }
  0xab   : > { %v1519_v23 = vpop.eup %1518  ;;  %1006 = vst [vmem:[%s2068_s17 + $0x328] sm:$0xff] %v1517_v20  ;;  %1544 = vpow2.f32 %v623_v12  ;;  %v276_v12 = vld [vmem:[%s2039_s30 + $0x458] sm:$0xff]  ;;  %v669_v17 = vmul.f32 1.442695, %v275_v9 }
  0xac   : > { %v1521_v26 = vpop.eup %1520  ;;  %1007 = vst [vmem:[%s2068_s17 + $0x330] sm:$0xff] %v1519_v23  ;;  %1546 = vpow2.f32 %v625_v15  ;;  %v277_v15 = vld [vmem:[%s2039_s30 + $0x460] sm:$0xff]  ;;  %v671_v20 = vmul.f32 1.442695, %v276_v12 }
  0xad   : > { %v1523_v29 = vpop.eup %1522  ;;  %1008 = vst [vmem:[%s2068_s17 + $0x338] sm:$0xff] %v1521_v26  ;;  %1548 = vpow2.f32 %v627_v18  ;;  %v278_v18 = vld [vmem:[%s2039_s30 + $0x468] sm:$0xff]  ;;  %v673_v23 = vmul.f32 1.442695, %v277_v15 }
  0xae   : > { %v1525_v32 = vpop.eup %1524  ;;  %1009 = vst [vmem:[%s2068_s17 + $0x340] sm:$0xff] %v1523_v29  ;;  %1550 = vpow2.f32 %v629_v21  ;;  %v279_v21 = vld [vmem:[%s2039_s30 + $0x470] sm:$0xff]  ;;  %v675_v26 = vmul.f32 1.442695, %v278_v18 }
  0xaf   : > { %v1527_v35 = vpop.eup %1526  ;;  %1010 = vst [vmem:[%s2068_s17 + $0x348] sm:$0xff] %v1525_v32  ;;  %1552 = vpow2.f32 %v631_v24  ;;  %v280_v24 = vld [vmem:[%s2039_s30 + $0x478] sm:$0xff]  ;;  %v677_v29 = vmul.f32 1.442695, %v279_v21 }
  0xb0   : > { %v1529_v38 = vpop.eup %1528  ;;  %1011 = vst [vmem:[%s2068_s17 + $0x350] sm:$0xff] %v1527_v35  ;;  %1554 = vpow2.f32 %v633_v27  ;;  %v281_v27 = vld [vmem:[%s2039_s30 + $0x480] sm:$0xff]  ;;  %v679_v32 = vmul.f32 1.442695, %v280_v24 }
  0xb1   : > { %v1531_v41 = vpop.eup %1530  ;;  %1012 = vst [vmem:[%s2068_s17 + $0x358] sm:$0xff] %v1529_v38  ;;  %1556 = vpow2.f32 %v635_v30  ;;  %v282_v30 = vld [vmem:[%s2039_s30 + $0x488] sm:$0xff]  ;;  %v681_v35 = vmul.f32 1.442695, %v281_v27 }
  0xb2   : > { %v1533_v44 = vpop.eup %1532  ;;  %1013 = vst [vmem:[%s2068_s17 + $0x360] sm:$0xff] %v1531_v41  ;;  %1558 = vpow2.f32 %v637_v33  ;;  %v283_v33 = vld [vmem:[%s2039_s30 + $0x490] sm:$0xff]  ;;  %v683_v38 = vmul.f32 1.442695, %v282_v30 }
  0xb3   : > { %v1535_v47 = vpop.eup %1534  ;;  %1014 = vst [vmem:[%s2068_s17 + $0x368] sm:$0xff] %v1533_v44  ;;  %1560 = vpow2.f32 %v639_v36  ;;  %v284_v36 = vld [vmem:[%s2039_s30 + $0x498] sm:$0xff]  ;;  %v685_v41 = vmul.f32 1.442695, %v283_v33 }
  0xb4   : > { %v1537_v50 = vpop.eup %1536  ;;  %1015 = vst [vmem:[%s2068_s17 + $0x370] sm:$0xff] %v1535_v47  ;;  %1562 = vpow2.f32 %v641_v39  ;;  %v285_v39 = vld [vmem:[%s2039_s30 + $0x4a0] sm:$0xff]  ;;  %v687_v44 = vmul.f32 1.442695, %v284_v36 }
  0xb5   : > { %v1539_v53 = vpop.eup %1538  ;;  %1016 = vst [vmem:[%s2068_s17 + $0x378] sm:$0xff] %v1537_v50  ;;  %1564 = vpow2.f32 %v643_v42  ;;  %v286_v42 = vld [vmem:[%s2039_s30 + $0x4a8] sm:$0xff]  ;;  %v689_v47 = vmul.f32 1.442695, %v285_v39 }
  0xb6   : > { %v1541_v56 = vpop.eup %1540  ;;  %1017 = vst [vmem:[%s2068_s17 + $0x380] sm:$0xff] %v1539_v53  ;;  %1566 = vpow2.f32 %v645_v45  ;;  %v287_v45 = vld [vmem:[%s2039_s30 + $0x4b0] sm:$0xff]  ;;  %v691_v50 = vmul.f32 1.442695, %v286_v42 }
  0xb7   : > { %v1543_v59 = vpop.eup %1542  ;;  %1018 = vst [vmem:[%s2068_s17 + $0x388] sm:$0xff] %v1541_v56  ;;  %1568 = vpow2.f32 %v647_v48  ;;  %v288_v48 = vld [vmem:[%s2039_s30 + $0x4b8] sm:$0xff]  ;;  %v693_v53 = vmul.f32 1.442695, %v287_v45 }
  0xb8   : > { %v1545_v62 = vpop.eup %1544  ;;  %1019 = vst [vmem:[%s2068_s17 + $0x390] sm:$0xff] %v1543_v59  ;;  %1570 = vpow2.f32 %v649_v51  ;;  %v289_v51 = vld [vmem:[%s2039_s30 + $0x4c0] sm:$0xff]  ;;  %v695_v56 = vmul.f32 1.442695, %v288_v48 }
  0xb9   : > { %v1547_v1 = vpop.eup %1546  ;;  %1020 = vst [vmem:[%s2068_s17 + $0x398] sm:$0xff] %v1545_v62  ;;  %1572 = vpow2.f32 %v651_v54  ;;  %v290_v54 = vld [vmem:[%s2039_s30 + $0x4c8] sm:$0xff]  ;;  %v697_v59 = vmul.f32 1.442695, %v289_v51 }
  0xba   : > { %v1549_v4 = vpop.eup %1548  ;;  %1021 = vst [vmem:[%s2068_s17 + $0x3a0] sm:$0xff] %v1547_v1  ;;  %1574 = vpow2.f32 %v653_v57  ;;  %v291_v57 = vld [vmem:[%s2039_s30 + $0x4d0] sm:$0xff]  ;;  %v699_v62 = vmul.f32 1.442695, %v290_v54 }
  0xbb   : > { %v1551_v7 = vpop.eup %1550  ;;  %1022 = vst [vmem:[%s2068_s17 + $0x3a8] sm:$0xff] %v1549_v4  ;;  %1576 = vpow2.f32 %v655_v60  ;;  %v292_v60 = vld [vmem:[%s2039_s30 + $0x4d8] sm:$0xff]  ;;  %v701_v1 = vmul.f32 1.442695, %v291_v57 }
  0xbc   : > { %v1553_v10 = vpop.eup %1552  ;;  %1023 = vst [vmem:[%s2068_s17 + $0x3b0] sm:$0xff] %v1551_v7  ;;  %1578 = vpow2.f32 %v657_v63  ;;  %v293_v63 = vld [vmem:[%s2039_s30 + $0x4e0] sm:$0xff]  ;;  %v703_v4 = vmul.f32 1.442695, %v292_v60 }
  0xbd   : > { %v1555_v13 = vpop.eup %1554  ;;  %1024 = vst [vmem:[%s2068_s17 + $0x3b8] sm:$0xff] %v1553_v10  ;;  %1580 = vpow2.f32 %v659_v2  ;;  %v294_v2 = vld [vmem:[%s2039_s30 + $0x4e8] sm:$0xff]  ;;  %v705_v7 = vmul.f32 1.442695, %v293_v63 }
  0xbe   : > { %v1557_v16 = vpop.eup %1556  ;;  %1025 = vst [vmem:[%s2068_s17 + $0x3c0] sm:$0xff] %v1555_v13  ;;  %1582 = vpow2.f32 %v661_v5  ;;  %v295_v5 = vld [vmem:[%s2039_s30 + $0x4f0] sm:$0xff]  ;;  %v707_v10 = vmul.f32 1.442695, %v294_v2 }
  0xbf   : > { %v1559_v19 = vpop.eup %1558  ;;  %1026 = vst [vmem:[%s2068_s17 + $0x3c8] sm:$0xff] %v1557_v16  ;;  %1584 = vpow2.f32 %v663_v8  ;;  %v296_v8 = vld [vmem:[%s2039_s30 + $0x4f8] sm:$0xff]  ;;  %v709_v13 = vmul.f32 1.442695, %v295_v5 }
  0xc0   : > { %v1561_v22 = vpop.eup %1560  ;;  %1027 = vst [vmem:[%s2068_s17 + $0x3d0] sm:$0xff] %v1559_v19  ;;  %1586 = vpow2.f32 %v665_v11  ;;  %v297_v11 = vld [vmem:[%s2039_s30 + $0x500] sm:$0xff]  ;;  %v711_v16 = vmul.f32 1.442695, %v296_v8 }
  0xc1   : > { %v1563_v25 = vpop.eup %1562  ;;  %1028 = vst [vmem:[%s2068_s17 + $0x3d8] sm:$0xff] %v1561_v22  ;;  %1588 = vpow2.f32 %v667_v14  ;;  %v298_v14 = vld [vmem:[%s2039_s30 + $0x508] sm:$0xff]  ;;  %v713_v19 = vmul.f32 1.442695, %v297_v11 }
  0xc2   : > { %v1565_v28 = vpop.eup %1564  ;;  %1029 = vst [vmem:[%s2068_s17 + $0x3e0] sm:$0xff] %v1563_v25  ;;  %1590 = vpow2.f32 %v669_v17  ;;  %v299_v17 = vld [vmem:[%s2039_s30 + $0x510] sm:$0xff]  ;;  %v715_v22 = vmul.f32 1.442695, %v298_v14 }
  0xc3   : > { %v1567_v31 = vpop.eup %1566  ;;  %1030 = vst [vmem:[%s2068_s17 + $0x3e8] sm:$0xff] %v1565_v28  ;;  %1592 = vpow2.f32 %v671_v20  ;;  %v300_v20 = vld [vmem:[%s2039_s30 + $0x518] sm:$0xff]  ;;  %v717_v25 = vmul.f32 1.442695, %v299_v17 }
  0xc4   : > { %v1569_v34 = vpop.eup %1568  ;;  %1031 = vst [vmem:[%s2068_s17 + $0x3f0] sm:$0xff] %v1567_v31  ;;  %1594 = vpow2.f32 %v673_v23  ;;  %v301_v23 = vld [vmem:[%s2039_s30 + $0x520] sm:$0xff]  ;;  %v719_v28 = vmul.f32 1.442695, %v300_v20 }
  0xc5   : > { %v1571_v37 = vpop.eup %1570  ;;  %1032 = vst [vmem:[%s2068_s17 + $0x3f8] sm:$0xff] %v1569_v34  ;;  %1596 = vpow2.f32 %v675_v26  ;;  %v302_v26 = vld [vmem:[%s2039_s30 + $0x528] sm:$0xff]  ;;  %v721_v31 = vmul.f32 1.442695, %v301_v23 }
  0xc6   : > { %v1573_v40 = vpop.eup %1572  ;;  %1033 = vst [vmem:[%s2068_s17 + $0x400] sm:$0xff] %v1571_v37  ;;  %1598 = vpow2.f32 %v677_v29  ;;  %v303_v29 = vld [vmem:[%s2039_s30 + $0x530] sm:$0xff]  ;;  %v723_v34 = vmul.f32 1.442695, %v302_v26 }
  0xc7   : > { %v1575_v43 = vpop.eup %1574  ;;  %1034 = vst [vmem:[%s2068_s17 + $0x408] sm:$0xff] %v1573_v40  ;;  %1600 = vpow2.f32 %v679_v32  ;;  %v304_v32 = vld [vmem:[%s2039_s30 + $0x538] sm:$0xff]  ;;  %v725_v37 = vmul.f32 1.442695, %v303_v29 }
  0xc8   : > { %v1577_v46 = vpop.eup %1576  ;;  %1035 = vst [vmem:[%s2068_s17 + $0x410] sm:$0xff] %v1575_v43  ;;  %1602 = vpow2.f32 %v681_v35  ;;  %v305_v35 = vld [vmem:[%s2039_s30 + $0x540] sm:$0xff]  ;;  %v727_v40 = vmul.f32 1.442695, %v304_v32 }
  0xc9   : > { %v1579_v49 = vpop.eup %1578  ;;  %1036 = vst [vmem:[%s2068_s17 + $0x418] sm:$0xff] %v1577_v46  ;;  %1604 = vpow2.f32 %v683_v38  ;;  %v306_v38 = vld [vmem:[%s2039_s30 + $0x548] sm:$0xff]  ;;  %v729_v43 = vmul.f32 1.442695, %v305_v35 }
  0xca   : > { %v1581_v52 = vpop.eup %1580  ;;  %1037 = vst [vmem:[%s2068_s17 + $0x420] sm:$0xff] %v1579_v49  ;;  %1606 = vpow2.f32 %v685_v41  ;;  %v307_v41 = vld [vmem:[%s2039_s30 + $0x550] sm:$0xff]  ;;  %v731_v46 = vmul.f32 1.442695, %v306_v38 }
  0xcb   : > { %v1583_v55 = vpop.eup %1582  ;;  %1038 = vst [vmem:[%s2068_s17 + $0x428] sm:$0xff] %v1581_v52  ;;  %1608 = vpow2.f32 %v687_v44  ;;  %v308_v44 = vld [vmem:[%s2039_s30 + $0x558] sm:$0xff]  ;;  %v733_v49 = vmul.f32 1.442695, %v307_v41 }
  0xcc   : > { %v1585_v58 = vpop.eup %1584  ;;  %1039 = vst [vmem:[%s2068_s17 + $0x430] sm:$0xff] %v1583_v55  ;;  %1610 = vpow2.f32 %v689_v47  ;;  %v309_v47 = vld [vmem:[%s2039_s30 + $0x560] sm:$0xff]  ;;  %v735_v52 = vmul.f32 1.442695, %v308_v44 }
  0xcd   : > { %v1587_v61 = vpop.eup %1586  ;;  %1040 = vst [vmem:[%s2068_s17 + $0x438] sm:$0xff] %v1585_v58  ;;  %1612 = vpow2.f32 %v691_v50  ;;  %v310_v50 = vld [vmem:[%s2039_s30 + $0x568] sm:$0xff]  ;;  %v737_v55 = vmul.f32 1.442695, %v309_v47 }
  0xce   : > { %v1589_v0 = vpop.eup %1588  ;;  %1041 = vst [vmem:[%s2068_s17 + $0x440] sm:$0xff] %v1587_v61  ;;  %1614 = vpow2.f32 %v693_v53  ;;  %v311_v53 = vld [vmem:[%s2039_s30 + $0x570] sm:$0xff]  ;;  %v739_v58 = vmul.f32 1.442695, %v310_v50 }
  0xcf   : > { %v1591_v3 = vpop.eup %1590  ;;  %1042 = vst [vmem:[%s2068_s17 + $0x448] sm:$0xff] %v1589_v0  ;;  %1616 = vpow2.f32 %v695_v56  ;;  %v312_v56 = vld [vmem:[%s2039_s30 + $0x578] sm:$0xff]  ;;  %v741_v61 = vmul.f32 1.442695, %v311_v53 }
  0xd0   : > { %v1593_v6 = vpop.eup %1592  ;;  %1043 = vst [vmem:[%s2068_s17 + $0x450] sm:$0xff] %v1591_v3  ;;  %1618 = vpow2.f32 %v697_v59  ;;  %v313_v59 = vld [vmem:[%s2039_s30 + $0x580] sm:$0xff]  ;;  %v743_v0 = vmul.f32 1.442695, %v312_v56 }
  0xd1   : > { %v1595_v9 = vpop.eup %1594  ;;  %1044 = vst [vmem:[%s2068_s17 + $0x458] sm:$0xff] %v1593_v6  ;;  %1620 = vpow2.f32 %v699_v62  ;;  %v314_v62 = vld [vmem:[%s2039_s30 + $0x588] sm:$0xff]  ;;  %v745_v3 = vmul.f32 1.442695, %v313_v59 }
  0xd2   : > { %v1597_v12 = vpop.eup %1596  ;;  %1045 = vst [vmem:[%s2068_s17 + $0x460] sm:$0xff] %v1595_v9  ;;  %1622 = vpow2.f32 %v701_v1  ;;  %v315_v1 = vld [vmem:[%s2039_s30 + $0x590] sm:$0xff]  ;;  %v747_v6 = vmul.f32 1.442695, %v314_v62 }
  0xd3   : > { %v1599_v15 = vpop.eup %1598  ;;  %1046 = vst [vmem:[%s2068_s17 + $0x468] sm:$0xff] %v1597_v12  ;;  %1624 = vpow2.f32 %v703_v4  ;;  %v316_v4 = vld [vmem:[%s2039_s30 + $0x598] sm:$0xff]  ;;  %v749_v9 = vmul.f32 1.442695, %v315_v1 }
  0xd4   : > { %v1601_v18 = vpop.eup %1600  ;;  %1047 = vst [vmem:[%s2068_s17 + $0x470] sm:$0xff] %v1599_v15  ;;  %1626 = vpow2.f32 %v705_v7  ;;  %v317_v7 = vld [vmem:[%s2039_s30 + $0x5a0] sm:$0xff]  ;;  %v751_v12 = vmul.f32 1.442695, %v316_v4 }
  0xd5   : > { %v1603_v21 = vpop.eup %1602  ;;  %1048 = vst [vmem:[%s2068_s17 + $0x478] sm:$0xff] %v1601_v18  ;;  %1628 = vpow2.f32 %v707_v10  ;;  %v318_v10 = vld [vmem:[%s2039_s30 + $0x5a8] sm:$0xff]  ;;  %v753_v15 = vmul.f32 1.442695, %v317_v7 }
  0xd6   : > { %v1605_v24 = vpop.eup %1604  ;;  %1049 = vst [vmem:[%s2068_s17 + $0x480] sm:$0xff] %v1603_v21  ;;  %1630 = vpow2.f32 %v709_v13  ;;  %v319_v13 = vld [vmem:[%s2039_s30 + $0x5b0] sm:$0xff]  ;;  %v755_v18 = vmul.f32 1.442695, %v318_v10 }
  0xd7   : > { %v1607_v27 = vpop.eup %1606  ;;  %1050 = vst [vmem:[%s2068_s17 + $0x488] sm:$0xff] %v1605_v24  ;;  %1632 = vpow2.f32 %v711_v16  ;;  %v320_v16 = vld [vmem:[%s2039_s30 + $0x5b8] sm:$0xff]  ;;  %v757_v21 = vmul.f32 1.442695, %v319_v13 }
  0xd8   : > { %v1609_v30 = vpop.eup %1608  ;;  %1051 = vst [vmem:[%s2068_s17 + $0x490] sm:$0xff] %v1607_v27  ;;  %1634 = vpow2.f32 %v713_v19  ;;  %v321_v19 = vld [vmem:[%s2039_s30 + $0x5c0] sm:$0xff]  ;;  %v759_v24 = vmul.f32 1.442695, %v320_v16 }
  0xd9   : > { %v1611_v33 = vpop.eup %1610  ;;  %1052 = vst [vmem:[%s2068_s17 + $0x498] sm:$0xff] %v1609_v30  ;;  %1636 = vpow2.f32 %v715_v22  ;;  %v322_v22 = vld [vmem:[%s2039_s30 + $0x5c8] sm:$0xff]  ;;  %v761_v27 = vmul.f32 1.442695, %v321_v19 }
  0xda   : > { %v1613_v36 = vpop.eup %1612  ;;  %1053 = vst [vmem:[%s2068_s17 + $0x4a0] sm:$0xff] %v1611_v33  ;;  %1638 = vpow2.f32 %v717_v25  ;;  %v323_v25 = vld [vmem:[%s2039_s30 + $0x5d0] sm:$0xff]  ;;  %v763_v30 = vmul.f32 1.442695, %v322_v22 }
  0xdb   : > { %v1615_v39 = vpop.eup %1614  ;;  %1054 = vst [vmem:[%s2068_s17 + $0x4a8] sm:$0xff] %v1613_v36  ;;  %1640 = vpow2.f32 %v719_v28  ;;  %v324_v28 = vld [vmem:[%s2039_s30 + $0x5d8] sm:$0xff]  ;;  %v765_v33 = vmul.f32 1.442695, %v323_v25 }
  0xdc   : > { %v1617_v42 = vpop.eup %1616  ;;  %1055 = vst [vmem:[%s2068_s17 + $0x4b0] sm:$0xff] %v1615_v39  ;;  %1642 = vpow2.f32 %v721_v31  ;;  %v325_v31 = vld [vmem:[%s2039_s30 + $0x5e0] sm:$0xff]  ;;  %v767_v36 = vmul.f32 1.442695, %v324_v28 }
  0xdd   : > { %v1619_v45 = vpop.eup %1618  ;;  %1056 = vst [vmem:[%s2068_s17 + $0x4b8] sm:$0xff] %v1617_v42  ;;  %1644 = vpow2.f32 %v723_v34  ;;  %v326_v34 = vld [vmem:[%s2039_s30 + $0x5e8] sm:$0xff]  ;;  %v769_v39 = vmul.f32 1.442695, %v325_v31 }
  0xde   : > { %v1621_v48 = vpop.eup %1620  ;;  %1057 = vst [vmem:[%s2068_s17 + $0x4c0] sm:$0xff] %v1619_v45  ;;  %1646 = vpow2.f32 %v725_v37  ;;  %v327_v37 = vld [vmem:[%s2039_s30 + $0x5f0] sm:$0xff]  ;;  %v771_v42 = vmul.f32 1.442695, %v326_v34 }
  0xdf   : > { %v1623_v51 = vpop.eup %1622  ;;  %1058 = vst [vmem:[%s2068_s17 + $0x4c8] sm:$0xff] %v1621_v48  ;;  %1648 = vpow2.f32 %v727_v40  ;;  %v328_v40 = vld [vmem:[%s2039_s30 + $0x5f8] sm:$0xff]  ;;  %v773_v45 = vmul.f32 1.442695, %v327_v37 }
  0xe0   : > { %v1625_v54 = vpop.eup %1624  ;;  %1059 = vst [vmem:[%s2068_s17 + $0x4d0] sm:$0xff] %v1623_v51  ;;  %1650 = vpow2.f32 %v729_v43  ;;  %v329_v43 = vld [vmem:[%s2039_s30 + $0x600] sm:$0xff]  ;;  %v775_v48 = vmul.f32 1.442695, %v328_v40 }
  0xe1   : > { %v1627_v57 = vpop.eup %1626  ;;  %1060 = vst [vmem:[%s2068_s17 + $0x4d8] sm:$0xff] %v1625_v54  ;;  %1652 = vpow2.f32 %v731_v46  ;;  %v330_v46 = vld [vmem:[%s2039_s30 + $0x608] sm:$0xff]  ;;  %v777_v51 = vmul.f32 1.442695, %v329_v43 }
  0xe2   : > { %v1629_v60 = vpop.eup %1628  ;;  %1061 = vst [vmem:[%s2068_s17 + $0x4e0] sm:$0xff] %v1627_v57  ;;  %1654 = vpow2.f32 %v733_v49  ;;  %v331_v49 = vld [vmem:[%s2039_s30 + $0x610] sm:$0xff]  ;;  %v779_v54 = vmul.f32 1.442695, %v330_v46 }
  0xe3   : > { %v1631_v63 = vpop.eup %1630  ;;  %1062 = vst [vmem:[%s2068_s17 + $0x4e8] sm:$0xff] %v1629_v60  ;;  %1656 = vpow2.f32 %v735_v52  ;;  %v332_v52 = vld [vmem:[%s2039_s30 + $0x618] sm:$0xff]  ;;  %v781_v57 = vmul.f32 1.442695, %v331_v49 }
  0xe4   : > { %v1633_v2 = vpop.eup %1632  ;;  %1063 = vst [vmem:[%s2068_s17 + $0x4f0] sm:$0xff] %v1631_v63  ;;  %1658 = vpow2.f32 %v737_v55  ;;  %v333_v55 = vld [vmem:[%s2039_s30 + $0x620] sm:$0xff]  ;;  %v783_v60 = vmul.f32 1.442695, %v332_v52 }
  0xe5   : > { %v1635_v5 = vpop.eup %1634  ;;  %1064 = vst [vmem:[%s2068_s17 + $0x4f8] sm:$0xff] %v1633_v2  ;;  %1660 = vpow2.f32 %v739_v58  ;;  %v334_v58 = vld [vmem:[%s2039_s30 + $0x628] sm:$0xff]  ;;  %v785_v63 = vmul.f32 1.442695, %v333_v55 }
  0xe6   : > { %v1637_v8 = vpop.eup %1636  ;;  %1065 = vst [vmem:[%s2068_s17 + $0x500] sm:$0xff] %v1635_v5  ;;  %1662 = vpow2.f32 %v741_v61  ;;  %v335_v61 = vld [vmem:[%s2039_s30 + $0x630] sm:$0xff]  ;;  %v787_v2 = vmul.f32 1.442695, %v334_v58 }
  0xe7   : > { %v1639_v11 = vpop.eup %1638  ;;  %1066 = vst [vmem:[%s2068_s17 + $0x508] sm:$0xff] %v1637_v8  ;;  %1664 = vpow2.f32 %v743_v0  ;;  %v336_v0 = vld [vmem:[%s2039_s30 + $0x638] sm:$0xff]  ;;  %v789_v5 = vmul.f32 1.442695, %v335_v61 }
  0xe8   : > { %v1641_v14 = vpop.eup %1640  ;;  %1067 = vst [vmem:[%s2068_s17 + $0x510] sm:$0xff] %v1639_v11  ;;  %1666 = vpow2.f32 %v745_v3  ;;  %v337_v3 = vld [vmem:[%s2039_s30 + $0x640] sm:$0xff]  ;;  %v791_v8 = vmul.f32 1.442695, %v336_v0 }
  0xe9   : > { %v1643_v17 = vpop.eup %1642  ;;  %1068 = vst [vmem:[%s2068_s17 + $0x518] sm:$0xff] %v1641_v14  ;;  %1668 = vpow2.f32 %v747_v6  ;;  %v338_v6 = vld [vmem:[%s2039_s30 + $0x648] sm:$0xff]  ;;  %v793_v11 = vmul.f32 1.442695, %v337_v3 }
  0xea   : > { %v1645_v20 = vpop.eup %1644  ;;  %1069 = vst [vmem:[%s2068_s17 + $0x520] sm:$0xff] %v1643_v17  ;;  %1670 = vpow2.f32 %v749_v9  ;;  %v339_v9 = vld [vmem:[%s2039_s30 + $0x650] sm:$0xff]  ;;  %v795_v14 = vmul.f32 1.442695, %v338_v6 }
  0xeb   : > { %v1647_v23 = vpop.eup %1646  ;;  %1070 = vst [vmem:[%s2068_s17 + $0x528] sm:$0xff] %v1645_v20  ;;  %1672 = vpow2.f32 %v751_v12  ;;  %v340_v12 = vld [vmem:[%s2039_s30 + $0x658] sm:$0xff]  ;;  %v797_v17 = vmul.f32 1.442695, %v339_v9 }
  0xec   : > { %v1649_v26 = vpop.eup %1648  ;;  %1071 = vst [vmem:[%s2068_s17 + $0x530] sm:$0xff] %v1647_v23  ;;  %1674 = vpow2.f32 %v753_v15  ;;  %v341_v15 = vld [vmem:[%s2039_s30 + $0x660] sm:$0xff]  ;;  %v799_v20 = vmul.f32 1.442695, %v340_v12 }
  0xed   : > { %v1651_v29 = vpop.eup %1650  ;;  %1072 = vst [vmem:[%s2068_s17 + $0x538] sm:$0xff] %v1649_v26  ;;  %1676 = vpow2.f32 %v755_v18  ;;  %v342_v18 = vld [vmem:[%s2039_s30 + $0x668] sm:$0xff]  ;;  %v801_v23 = vmul.f32 1.442695, %v341_v15 }
  0xee   : > { %v1653_v32 = vpop.eup %1652  ;;  %1073 = vst [vmem:[%s2068_s17 + $0x540] sm:$0xff] %v1651_v29  ;;  %1678 = vpow2.f32 %v757_v21  ;;  %v343_v21 = vld [vmem:[%s2039_s30 + $0x670] sm:$0xff]  ;;  %v803_v26 = vmul.f32 1.442695, %v342_v18 }
  0xef   : > { %v1655_v35 = vpop.eup %1654  ;;  %1074 = vst [vmem:[%s2068_s17 + $0x548] sm:$0xff] %v1653_v32  ;;  %1680 = vpow2.f32 %v759_v24  ;;  %v344_v24 = vld [vmem:[%s2039_s30 + $0x678] sm:$0xff]  ;;  %v805_v29 = vmul.f32 1.442695, %v343_v21 }
  0xf0   : > { %v1657_v38 = vpop.eup %1656  ;;  %1075 = vst [vmem:[%s2068_s17 + $0x550] sm:$0xff] %v1655_v35  ;;  %1682 = vpow2.f32 %v761_v27  ;;  %v345_v27 = vld [vmem:[%s2039_s30 + $0x680] sm:$0xff]  ;;  %v807_v32 = vmul.f32 1.442695, %v344_v24 }
  0xf1   : > { %v1659_v41 = vpop.eup %1658  ;;  %1076 = vst [vmem:[%s2068_s17 + $0x558] sm:$0xff] %v1657_v38  ;;  %1684 = vpow2.f32 %v763_v30  ;;  %v346_v30 = vld [vmem:[%s2039_s30 + $0x688] sm:$0xff]  ;;  %v809_v35 = vmul.f32 1.442695, %v345_v27 }
  0xf2   : > { %v1661_v44 = vpop.eup %1660  ;;  %1077 = vst [vmem:[%s2068_s17 + $0x560] sm:$0xff] %v1659_v41  ;;  %1686 = vpow2.f32 %v765_v33  ;;  %v347_v33 = vld [vmem:[%s2039_s30 + $0x690] sm:$0xff]  ;;  %v811_v38 = vmul.f32 1.442695, %v346_v30 }
  0xf3   : > { %v1663_v47 = vpop.eup %1662  ;;  %1078 = vst [vmem:[%s2068_s17 + $0x568] sm:$0xff] %v1661_v44  ;;  %1688 = vpow2.f32 %v767_v36  ;;  %v348_v36 = vld [vmem:[%s2039_s30 + $0x698] sm:$0xff]  ;;  %v813_v41 = vmul.f32 1.442695, %v347_v33 }
  0xf4   : > { %v1665_v50 = vpop.eup %1664  ;;  %1079 = vst [vmem:[%s2068_s17 + $0x570] sm:$0xff] %v1663_v47  ;;  %1690 = vpow2.f32 %v769_v39  ;;  %v349_v39 = vld [vmem:[%s2039_s30 + $0x6a0] sm:$0xff]  ;;  %v815_v44 = vmul.f32 1.442695, %v348_v36 }
  0xf5   : > { %v1667_v53 = vpop.eup %1666  ;;  %1080 = vst [vmem:[%s2068_s17 + $0x578] sm:$0xff] %v1665_v50  ;;  %1692 = vpow2.f32 %v771_v42  ;;  %v350_v42 = vld [vmem:[%s2039_s30 + $0x6a8] sm:$0xff]  ;;  %v817_v47 = vmul.f32 1.442695, %v349_v39 }
  0xf6   : > { %v1669_v56 = vpop.eup %1668  ;;  %1081 = vst [vmem:[%s2068_s17 + $0x580] sm:$0xff] %v1667_v53  ;;  %1694 = vpow2.f32 %v773_v45  ;;  %v351_v45 = vld [vmem:[%s2039_s30 + $0x6b0] sm:$0xff]  ;;  %v819_v50 = vmul.f32 1.442695, %v350_v42 }
  0xf7   : > { %v1671_v59 = vpop.eup %1670  ;;  %1082 = vst [vmem:[%s2068_s17 + $0x588] sm:$0xff] %v1669_v56  ;;  %1696 = vpow2.f32 %v775_v48  ;;  %v352_v48 = vld [vmem:[%s2039_s30 + $0x6b8] sm:$0xff]  ;;  %v821_v53 = vmul.f32 1.442695, %v351_v45 }
  0xf8   : > { %v1673_v62 = vpop.eup %1672  ;;  %1083 = vst [vmem:[%s2068_s17 + $0x590] sm:$0xff] %v1671_v59  ;;  %1698 = vpow2.f32 %v777_v51  ;;  %v353_v51 = vld [vmem:[%s2039_s30 + $0x6c0] sm:$0xff]  ;;  %v823_v56 = vmul.f32 1.442695, %v352_v48 }
  0xf9   : > { %v1675_v1 = vpop.eup %1674  ;;  %1084 = vst [vmem:[%s2068_s17 + $0x598] sm:$0xff] %v1673_v62  ;;  %1700 = vpow2.f32 %v779_v54  ;;  %v354_v54 = vld [vmem:[%s2039_s30 + $0x6c8] sm:$0xff]  ;;  %v825_v59 = vmul.f32 1.442695, %v353_v51 }
  0xfa   : > { %v1677_v4 = vpop.eup %1676  ;;  %1085 = vst [vmem:[%s2068_s17 + $0x5a0] sm:$0xff] %v1675_v1  ;;  %1702 = vpow2.f32 %v781_v57  ;;  %v355_v57 = vld [vmem:[%s2039_s30 + $0x6d0] sm:$0xff]  ;;  %v827_v62 = vmul.f32 1.442695, %v354_v54 }
  0xfb   : > { %v1679_v7 = vpop.eup %1678  ;;  %1086 = vst [vmem:[%s2068_s17 + $0x5a8] sm:$0xff] %v1677_v4  ;;  %1704 = vpow2.f32 %v783_v60  ;;  %v356_v60 = vld [vmem:[%s2039_s30 + $0x6d8] sm:$0xff]  ;;  %v829_v1 = vmul.f32 1.442695, %v355_v57 }
  0xfc   : > { %v1681_v10 = vpop.eup %1680  ;;  %1087 = vst [vmem:[%s2068_s17 + $0x5b0] sm:$0xff] %v1679_v7  ;;  %1706 = vpow2.f32 %v785_v63  ;;  %v357_v63 = vld [vmem:[%s2039_s30 + $0x6e0] sm:$0xff]  ;;  %v831_v4 = vmul.f32 1.442695, %v356_v60 }
  0xfd   : > { %v1683_v13 = vpop.eup %1682  ;;  %1088 = vst [vmem:[%s2068_s17 + $0x5b8] sm:$0xff] %v1681_v10  ;;  %1708 = vpow2.f32 %v787_v2  ;;  %v358_v2 = vld [vmem:[%s2039_s30 + $0x6e8] sm:$0xff]  ;;  %v833_v7 = vmul.f32 1.442695, %v357_v63 }
  0xfe   : > { %v1685_v16 = vpop.eup %1684  ;;  %1089 = vst [vmem:[%s2068_s17 + $0x5c0] sm:$0xff] %v1683_v13  ;;  %1710 = vpow2.f32 %v789_v5  ;;  %v359_v5 = vld [vmem:[%s2039_s30 + $0x6f0] sm:$0xff]  ;;  %v835_v10 = vmul.f32 1.442695, %v358_v2 }
  0xff   : > { %v1687_v19 = vpop.eup %1686  ;;  %1090 = vst [vmem:[%s2068_s17 + $0x5c8] sm:$0xff] %v1685_v16  ;;  %1712 = vpow2.f32 %v791_v8  ;;  %v360_v8 = vld [vmem:[%s2039_s30 + $0x6f8] sm:$0xff]  ;;  %v837_v13 = vmul.f32 1.442695, %v359_v5 }
 0x100   : > { %v1689_v22 = vpop.eup %1688  ;;  %1091 = vst [vmem:[%s2068_s17 + $0x5d0] sm:$0xff] %v1687_v19  ;;  %1714 = vpow2.f32 %v793_v11  ;;  %v361_v11 = vld [vmem:[%s2039_s30 + $0x700] sm:$0xff]  ;;  %v839_v16 = vmul.f32 1.442695, %v360_v8 }
 0x101   : > { %v1691_v25 = vpop.eup %1690  ;;  %1092 = vst [vmem:[%s2068_s17 + $0x5d8] sm:$0xff] %v1689_v22  ;;  %1716 = vpow2.f32 %v795_v14  ;;  %v362_v14 = vld [vmem:[%s2039_s30 + $0x708] sm:$0xff]  ;;  %v841_v19 = vmul.f32 1.442695, %v361_v11 }
 0x102   : > { %v1693_v28 = vpop.eup %1692  ;;  %1093 = vst [vmem:[%s2068_s17 + $0x5e0] sm:$0xff] %v1691_v25  ;;  %1718 = vpow2.f32 %v797_v17  ;;  %v363_v17 = vld [vmem:[%s2039_s30 + $0x710] sm:$0xff]  ;;  %v843_v22 = vmul.f32 1.442695, %v362_v14 }
 0x103   : > { %v1695_v31 = vpop.eup %1694  ;;  %1094 = vst [vmem:[%s2068_s17 + $0x5e8] sm:$0xff] %v1693_v28  ;;  %1720 = vpow2.f32 %v799_v20  ;;  %v364_v20 = vld [vmem:[%s2039_s30 + $0x718] sm:$0xff]  ;;  %v845_v25 = vmul.f32 1.442695, %v363_v17 }
 0x104   : > { %v1697_v34 = vpop.eup %1696  ;;  %1095 = vst [vmem:[%s2068_s17 + $0x5f0] sm:$0xff] %v1695_v31  ;;  %1722 = vpow2.f32 %v801_v23  ;;  %v365_v23 = vld [vmem:[%s2039_s30 + $0x720] sm:$0xff]  ;;  %v847_v28 = vmul.f32 1.442695, %v364_v20 }
 0x105   : > { %v1699_v37 = vpop.eup %1698  ;;  %1096 = vst [vmem:[%s2068_s17 + $0x5f8] sm:$0xff] %v1697_v34  ;;  %1724 = vpow2.f32 %v803_v26  ;;  %v366_v26 = vld [vmem:[%s2039_s30 + $0x728] sm:$0xff]  ;;  %v849_v31 = vmul.f32 1.442695, %v365_v23 }
 0x106   : > { %v1701_v40 = vpop.eup %1700  ;;  %1097 = vst [vmem:[%s2068_s17 + $0x600] sm:$0xff] %v1699_v37  ;;  %1726 = vpow2.f32 %v805_v29  ;;  %v367_v29 = vld [vmem:[%s2039_s30 + $0x730] sm:$0xff]  ;;  %v851_v34 = vmul.f32 1.442695, %v366_v26 }
 0x107   : > { %v1703_v43 = vpop.eup %1702  ;;  %1098 = vst [vmem:[%s2068_s17 + $0x608] sm:$0xff] %v1701_v40  ;;  %1728 = vpow2.f32 %v807_v32  ;;  %v368_v32 = vld [vmem:[%s2039_s30 + $0x738] sm:$0xff]  ;;  %v853_v37 = vmul.f32 1.442695, %v367_v29 }
 0x108   : > { %v1705_v46 = vpop.eup %1704  ;;  %1099 = vst [vmem:[%s2068_s17 + $0x610] sm:$0xff] %v1703_v43  ;;  %1730 = vpow2.f32 %v809_v35  ;;  %v369_v35 = vld [vmem:[%s2039_s30 + $0x740] sm:$0xff]  ;;  %v855_v40 = vmul.f32 1.442695, %v368_v32 }
 0x109   : > { %v1707_v49 = vpop.eup %1706  ;;  %1100 = vst [vmem:[%s2068_s17 + $0x618] sm:$0xff] %v1705_v46  ;;  %1732 = vpow2.f32 %v811_v38  ;;  %v370_v38 = vld [vmem:[%s2039_s30 + $0x748] sm:$0xff]  ;;  %v857_v43 = vmul.f32 1.442695, %v369_v35 }
 0x10a   : > { %v1709_v52 = vpop.eup %1708  ;;  %1101 = vst [vmem:[%s2068_s17 + $0x620] sm:$0xff] %v1707_v49  ;;  %1734 = vpow2.f32 %v813_v41  ;;  %v371_v41 = vld [vmem:[%s2039_s30 + $0x750] sm:$0xff]  ;;  %v859_v46 = vmul.f32 1.442695, %v370_v38 }
 0x10b   : > { %v1711_v55 = vpop.eup %1710  ;;  %1102 = vst [vmem:[%s2068_s17 + $0x628] sm:$0xff] %v1709_v52  ;;  %1736 = vpow2.f32 %v815_v44  ;;  %v372_v44 = vld [vmem:[%s2039_s30 + $0x758] sm:$0xff]  ;;  %v861_v49 = vmul.f32 1.442695, %v371_v41 }
 0x10c   : > { %v1713_v58 = vpop.eup %1712  ;;  %1103 = vst [vmem:[%s2068_s17 + $0x630] sm:$0xff] %v1711_v55  ;;  %1738 = vpow2.f32 %v817_v47  ;;  %v373_v47 = vld [vmem:[%s2039_s30 + $0x760] sm:$0xff]  ;;  %v863_v52 = vmul.f32 1.442695, %v372_v44 }
 0x10d   : > { %v1715_v61 = vpop.eup %1714  ;;  %1104 = vst [vmem:[%s2068_s17 + $0x638] sm:$0xff] %v1713_v58  ;;  %1740 = vpow2.f32 %v819_v50  ;;  %v374_v50 = vld [vmem:[%s2039_s30 + $0x768] sm:$0xff]  ;;  %v865_v55 = vmul.f32 1.442695, %v373_v47 }
 0x10e   : > { %v1717_v0 = vpop.eup %1716  ;;  %1105 = vst [vmem:[%s2068_s17 + $0x640] sm:$0xff] %v1715_v61  ;;  %1742 = vpow2.f32 %v821_v53  ;;  %v375_v53 = vld [vmem:[%s2039_s30 + $0x770] sm:$0xff]  ;;  %v867_v58 = vmul.f32 1.442695, %v374_v50 }
 0x10f   : > { %v1719_v3 = vpop.eup %1718  ;;  %1106 = vst [vmem:[%s2068_s17 + $0x648] sm:$0xff] %v1717_v0  ;;  %1744 = vpow2.f32 %v823_v56  ;;  %v376_v56 = vld [vmem:[%s2039_s30 + $0x778] sm:$0xff]  ;;  %v869_v61 = vmul.f32 1.442695, %v375_v53 }
 0x110   : > { %v1721_v6 = vpop.eup %1720  ;;  %1107 = vst [vmem:[%s2068_s17 + $0x650] sm:$0xff] %v1719_v3  ;;  %1746 = vpow2.f32 %v825_v59  ;;  %v377_v59 = vld [vmem:[%s2039_s30 + $0x780] sm:$0xff]  ;;  %v871_v0 = vmul.f32 1.442695, %v376_v56 }
 0x111   : > { %v1723_v9 = vpop.eup %1722  ;;  %1108 = vst [vmem:[%s2068_s17 + $0x658] sm:$0xff] %v1721_v6  ;;  %1748 = vpow2.f32 %v827_v62  ;;  %v378_v62 = vld [vmem:[%s2039_s30 + $0x788] sm:$0xff]  ;;  %v873_v3 = vmul.f32 1.442695, %v377_v59 }
 0x112   : > { %v1725_v12 = vpop.eup %1724  ;;  %1109 = vst [vmem:[%s2068_s17 + $0x660] sm:$0xff] %v1723_v9  ;;  %1750 = vpow2.f32 %v829_v1  ;;  %v379_v1 = vld [vmem:[%s2039_s30 + $0x790] sm:$0xff]  ;;  %v875_v6 = vmul.f32 1.442695, %v378_v62 }
 0x113   : > { %v1727_v15 = vpop.eup %1726  ;;  %1110 = vst [vmem:[%s2068_s17 + $0x668] sm:$0xff] %v1725_v12  ;;  %1752 = vpow2.f32 %v831_v4  ;;  %v380_v4 = vld [vmem:[%s2039_s30 + $0x798] sm:$0xff]  ;;  %v877_v9 = vmul.f32 1.442695, %v379_v1 }
 0x114   : > { %v1729_v18 = vpop.eup %1728  ;;  %1111 = vst [vmem:[%s2068_s17 + $0x670] sm:$0xff] %v1727_v15  ;;  %1754 = vpow2.f32 %v833_v7  ;;  %v381_v7 = vld [vmem:[%s2039_s30 + $0x7a0] sm:$0xff]  ;;  %v879_v12 = vmul.f32 1.442695, %v380_v4 }
 0x115   : > { %v1731_v21 = vpop.eup %1730  ;;  %1112 = vst [vmem:[%s2068_s17 + $0x678] sm:$0xff] %v1729_v18  ;;  %1756 = vpow2.f32 %v835_v10  ;;  %v382_v10 = vld [vmem:[%s2039_s30 + $0x7a8] sm:$0xff]  ;;  %v881_v15 = vmul.f32 1.442695, %v381_v7 }
 0x116   : > { %v1733_v24 = vpop.eup %1732  ;;  %1113 = vst [vmem:[%s2068_s17 + $0x680] sm:$0xff] %v1731_v21  ;;  %1758 = vpow2.f32 %v837_v13  ;;  %v383_v13 = vld [vmem:[%s2039_s30 + $0x7b0] sm:$0xff]  ;;  %v883_v18 = vmul.f32 1.442695, %v382_v10 }
 0x117   : > { %v1735_v27 = vpop.eup %1734  ;;  %1114 = vst [vmem:[%s2068_s17 + $0x688] sm:$0xff] %v1733_v24  ;;  %1760 = vpow2.f32 %v839_v16  ;;  %v384_v16 = vld [vmem:[%s2039_s30 + $0x7b8] sm:$0xff]  ;;  %v885_v21 = vmul.f32 1.442695, %v383_v13 }
 0x118   : > { %v1737_v30 = vpop.eup %1736  ;;  %1115 = vst [vmem:[%s2068_s17 + $0x690] sm:$0xff] %v1735_v27  ;;  %1762 = vpow2.f32 %v841_v19  ;;  %v385_v19 = vld [vmem:[%s2039_s30 + $0x7c0] sm:$0xff]  ;;  %v887_v24 = vmul.f32 1.442695, %v384_v16 }
 0x119   : > { %v1739_v33 = vpop.eup %1738  ;;  %1116 = vst [vmem:[%s2068_s17 + $0x698] sm:$0xff] %v1737_v30  ;;  %1764 = vpow2.f32 %v843_v22  ;;  %v386_v22 = vld [vmem:[%s2039_s30 + $0x7c8] sm:$0xff]  ;;  %v889_v27 = vmul.f32 1.442695, %v385_v19 }
 0x11a   : > { %v1741_v36 = vpop.eup %1740  ;;  %1117 = vst [vmem:[%s2068_s17 + $0x6a0] sm:$0xff] %v1739_v33  ;;  %1766 = vpow2.f32 %v845_v25  ;;  %v387_v25 = vld [vmem:[%s2039_s30 + $0x7d0] sm:$0xff]  ;;  %v891_v30 = vmul.f32 1.442695, %v386_v22 }
 0x11b   : > { %v1743_v39 = vpop.eup %1742  ;;  %1118 = vst [vmem:[%s2068_s17 + $0x6a8] sm:$0xff] %v1741_v36  ;;  %1768 = vpow2.f32 %v847_v28  ;;  %v388_v28 = vld [vmem:[%s2039_s30 + $0x7d8] sm:$0xff]  ;;  %v893_v33 = vmul.f32 1.442695, %v387_v25 }
 0x11c   : > { %v1745_v42 = vpop.eup %1744  ;;  %1119 = vst [vmem:[%s2068_s17 + $0x6b0] sm:$0xff] %v1743_v39  ;;  %1770 = vpow2.f32 %v849_v31  ;;  %v389_v31 = vld [vmem:[%s2039_s30 + $0x7e0] sm:$0xff]  ;;  %v895_v36 = vmul.f32 1.442695, %v388_v28 }
 0x11d   : > { %v1747_v45 = vpop.eup %1746  ;;  %1120 = vst [vmem:[%s2068_s17 + $0x6b8] sm:$0xff] %v1745_v42  ;;  %1772 = vpow2.f32 %v851_v34  ;;  %v390_v34 = vld [vmem:[%s2039_s30 + $0x7e8] sm:$0xff]  ;;  %v897_v39 = vmul.f32 1.442695, %v389_v31 }
 0x11e   : > { %v1749_v48 = vpop.eup %1748  ;;  %1121 = vst [vmem:[%s2068_s17 + $0x6c0] sm:$0xff] %v1747_v45  ;;  %1774 = vpow2.f32 %v853_v37  ;;  %v391_v37 = vld [vmem:[%s2039_s30 + $0x7f0] sm:$0xff]  ;;  %v899_v42 = vmul.f32 1.442695, %v390_v34 }
 0x11f   : > { %v1751_v51 = vpop.eup %1750  ;;  %1122 = vst [vmem:[%s2068_s17 + $0x6c8] sm:$0xff] %v1749_v48  ;;  %1776 = vpow2.f32 %v855_v40  ;;  %v392_v40 = vld [vmem:[%s2039_s30 + $0x7f8] sm:$0xff]  ;;  %v901_v44 = vmul.f32 1.442695, %v391_v37 }
 0x120   : > { %v1753_v54 = vpop.eup %1752  ;;  %1123 = vst [vmem:[%s2068_s17 + $0x6d0] sm:$0xff] %v1751_v51  ;;  %1778 = vpow2.f32 %v857_v43 }
 0x121   : > { %v1755_v57 = vpop.eup %1754  ;;  %1124 = vst [vmem:[%s2068_s17 + $0x6d8] sm:$0xff] %v1753_v54  ;;  %1780 = vpow2.f32 %v859_v46  ;;  %v903_v46 = vmul.f32 1.442695, %v392_v40 }
 0x122   : > { %v1757_v60 = vpop.eup %1756  ;;  %1125 = vst [vmem:[%s2068_s17 + $0x6e0] sm:$0xff] %v1755_v57  ;;  %1782 = vpow2.f32 %v861_v49 }
 0x123   : > { %v1759_v63 = vpop.eup %1758  ;;  %1126 = vst [vmem:[%s2068_s17 + $0x6e8] sm:$0xff] %v1757_v60  ;;  %1784 = vpow2.f32 %v863_v52 }
 0x124   : > { %v1761_v2 = vpop.eup %1760  ;;  %1127 = vst [vmem:[%s2068_s17 + $0x6f0] sm:$0xff] %v1759_v63  ;;  %1786 = vpow2.f32 %v865_v55 }
 0x125   : > { %v1763_v5 = vpop.eup %1762  ;;  %1128 = vst [vmem:[%s2068_s17 + $0x6f8] sm:$0xff] %v1761_v2  ;;  %1788 = vpow2.f32 %v867_v58 }
 0x126   : > { %v1765_v8 = vpop.eup %1764  ;;  %1129 = vst [vmem:[%s2068_s17 + $0x700] sm:$0xff] %v1763_v5  ;;  %1790 = vpow2.f32 %v869_v61 }
 0x127   : > { %v1767_v11 = vpop.eup %1766  ;;  %1130 = vst [vmem:[%s2068_s17 + $0x708] sm:$0xff] %v1765_v8  ;;  %1792 = vpow2.f32 %v871_v0 }
 0x128   : > { %v1769_v14 = vpop.eup %1768  ;;  %1131 = vst [vmem:[%s2068_s17 + $0x710] sm:$0xff] %v1767_v11  ;;  %1794 = vpow2.f32 %v873_v3 }
 0x129   : > { %v1771_v17 = vpop.eup %1770  ;;  %1132 = vst [vmem:[%s2068_s17 + $0x718] sm:$0xff] %v1769_v14  ;;  %1796 = vpow2.f32 %v875_v6 }
 0x12a   : > { %v1773_v20 = vpop.eup %1772  ;;  %1133 = vst [vmem:[%s2068_s17 + $0x720] sm:$0xff] %v1771_v17  ;;  %1798 = vpow2.f32 %v877_v9 }
 0x12b   : > { %v1775_v23 = vpop.eup %1774  ;;  %1134 = vst [vmem:[%s2068_s17 + $0x728] sm:$0xff] %v1773_v20  ;;  %1800 = vpow2.f32 %v879_v12 }
 0x12c   : > { %v1777_v26 = vpop.eup %1776  ;;  %1135 = vst [vmem:[%s2068_s17 + $0x730] sm:$0xff] %v1775_v23  ;;  %1802 = vpow2.f32 %v881_v15 }
 0x12d   : > { %v1779_v29 = vpop.eup %1778  ;;  %1136 = vst [vmem:[%s2068_s17 + $0x738] sm:$0xff] %v1777_v26  ;;  %1804 = vpow2.f32 %v883_v18 }
 0x12e   : > { %v1781_v32 = vpop.eup %1780  ;;  %1137 = vst [vmem:[%s2068_s17 + $0x740] sm:$0xff] %v1779_v29  ;;  %1806 = vpow2.f32 %v885_v21 }
 0x12f   : > { %v1783_v35 = vpop.eup %1782  ;;  %1138 = vst [vmem:[%s2068_s17 + $0x748] sm:$0xff] %v1781_v32  ;;  %1808 = vpow2.f32 %v887_v24 }
 0x130   : > { %v1785_v38 = vpop.eup %1784  ;;  %1139 = vst [vmem:[%s2068_s17 + $0x750] sm:$0xff] %v1783_v35  ;;  %1810 = vpow2.f32 %v889_v27 }
 0x131   : > { %v1787_v41 = vpop.eup %1786  ;;  %1140 = vst [vmem:[%s2068_s17 + $0x758] sm:$0xff] %v1785_v38  ;;  %1812 = vpow2.f32 %v891_v30 }
 0x132   : > { %v1789_v43 = vpop.eup %1788  ;;  %1141 = vst [vmem:[%s2068_s17 + $0x760] sm:$0xff] %v1787_v41  ;;  %1814 = vpow2.f32 %v893_v33 }
 0x133   : > { %v1791_v45 = vpop.eup %1790  ;;  %1142 = vst [vmem:[%s2068_s17 + $0x768] sm:$0xff] %v1789_v43  ;;  %1816 = vpow2.f32 %v895_v36 }
 0x134   : > { %v1793_v47 = vpop.eup %1792  ;;  %1143 = vst [vmem:[%s2068_s17 + $0x770] sm:$0xff] %v1791_v45  ;;  %1818 = vpow2.f32 %v897_v39 }
 0x135   : > { %v1795_v48 = vpop.eup %1794  ;;  %1144 = vst [vmem:[%s2068_s17 + $0x778] sm:$0xff] %v1793_v47  ;;  %1820 = vpow2.f32 %v899_v42 }
 0x136   : > { %v1797_v49 = vpop.eup %1796  ;;  %1145 = vst [vmem:[%s2068_s17 + $0x780] sm:$0xff] %v1795_v48  ;;  %1822 = vpow2.f32 %v901_v44 }
 0x137   : > { %v1799_v50 = vpop.eup %1798  ;;  %1146 = vst [vmem:[%s2068_s17 + $0x788] sm:$0xff] %v1797_v49  ;;  %1824 = vpow2.f32 %v903_v46 }
 0x138   : > { %v1801_v51 = vpop.eup %1800  ;;  %1147 = vst [vmem:[%s2068_s17 + $0x790] sm:$0xff] %v1799_v50 }
 0x139   : > { %v1803_v52 = vpop.eup %1802  ;;  %1148 = vst [vmem:[%s2068_s17 + $0x798] sm:$0xff] %v1801_v51 }
 0x13a   : > { %v1805_v53 = vpop.eup %1804  ;;  %1149 = vst [vmem:[%s2068_s17 + $0x7a0] sm:$0xff] %v1803_v52 }
 0x13b   : > { %v1807_v54 = vpop.eup %1806  ;;  %1150 = vst [vmem:[%s2068_s17 + $0x7a8] sm:$0xff] %v1805_v53 }
 0x13c   : > { %v1809_v55 = vpop.eup %1808  ;;  %1151 = vst [vmem:[%s2068_s17 + $0x7b0] sm:$0xff] %v1807_v54 }
 0x13d   : > { %v1811_v56 = vpop.eup %1810  ;;  %1152 = vst [vmem:[%s2068_s17 + $0x7b8] sm:$0xff] %v1809_v55 }
 0x13e   : > { %v1813_v57 = vpop.eup %1812  ;;  %1153 = vst [vmem:[%s2068_s17 + $0x7c0] sm:$0xff] %v1811_v56 }
 0x13f   : > { %v1815_v58 = vpop.eup %1814  ;;  %1154 = vst [vmem:[%s2068_s17 + $0x7c8] sm:$0xff] %v1813_v57 }
 0x140   : > { %v1817_v59 = vpop.eup %1816  ;;  %1155 = vst [vmem:[%s2068_s17 + $0x7d0] sm:$0xff] %v1815_v58 }
 0x141   : > { %v1819_v60 = vpop.eup %1818  ;;  %1156 = vst [vmem:[%s2068_s17 + $0x7d8] sm:$0xff] %v1817_v59 }
 0x142   : > { %v1821_v61 = vpop.eup %1820  ;;  %1157 = vst [vmem:[%s2068_s17 + $0x7e0] sm:$0xff] %v1819_v60 }
 0x143   : > { %v1823_v62 = vpop.eup %1822  ;;  %1158 = vst [vmem:[%s2068_s17 + $0x7e8] sm:$0xff] %v1821_v61 }
 0x144   : > { %v1825_v63 = vpop.eup %1824  ;;  %1159 = vst [vmem:[%s2068_s17 + $0x7f0] sm:$0xff] %v1823_v62 }
 0x145   : > { %1160 = vst [vmem:[%s2068_s17 + $0x7f8] sm:$0xff] %v1825_v63 }
 0x146   : > { %1867 = shalt.err (!%p1864_p10)
}
 0x147   : > { %s1868_s13 = scalar_lea.hbm %s2563_s2, 32768  ;;  %s1872_s20 = scalar_lea.hbm %s2612_s1, 65536 }
 0x148   : > { %p1869_p0 = scmp.ne.s32.totalorder %s2563_s2, %s1868_s13  ;;  %p1873_p1 = scmp.lt.s32.totalorder %s2563_s2, %s2612_s1 }
 0x149   : > { %p1874_p3 = scmp.lt.s32.totalorder %s1872_s20, %s1868_s13 }
 0x14a   : > { %p1870_p2 = pnand %p1869_p0, %p2621_p12 }
 0x14b   : > { %p1875_p6 = por %p1874_p3, %p1873_p1 }
 0x14c   : > { %p1871_p9 = pneg %p1870_p2 }
 0x14e   : > { %p1876_p11 = pnand %p1875_p6, %p1871_p9 }
 0x150   : > { %1879 = shalt.err (!%p1876_p11)
}
 0x151   : > { %s1924_s24 = smov 128   ;;  %s1925_s26 = smov 8  }
 0x152   : > { %1266 = dma.vmem_to_hbm [thread:$0]  (%p2621_p12), %s2566_s27, 32768, %s2563_s2, %s1162_s10, %s1924_s24, %s1924_s24, %s1925_s26  }
 0x153 PF: > { %s1190_s30 = sand.u32 1, %s1906_s6   ;;  %p2622_p13 = scmp.ne.s32.totalorder %s2618_s19, 0 }
 0x154   : > { %p2623_p4 = scmp.ge.s32.totalorder %s1918_s9, 2  ;;  %s1191_s17 = scalar_lea.sflag [#allocation4], %s1190_s30 }
 0x156   : > { %p1273_p5 = pnand %p2623_p4, %p2622_p13 }
 0x158   : > { %p1274_p7 = pneg %p1273_p5 }
 0x15a   : > { %1901 = dma.done.wait (%p1274_p7), %s1191_s17, 32768  }
 0x15b   : > { %1903 = vsyncadd (%p1274_p7), %s1191_s17, 4294934528  ;;  %p14_p8 = scmp.ge.s32.totalorder %s1961_s12, 4   ;;  %s2624_s6 = smov %s1910_s7 }
 0x15c   : > { %s2625_s7 = smov %s1914_s8  ;;  %s2626_s8 = smov %s1973_s15 }
 0x15d   : > { %s2627_s9 = smov %s1961_s12  ;;  %16 = sbr.rel (!%p14_p8) target bundleno = 5 (0x5), region = 69 }
 0x162   :  { %1196 = vsyncpa [#allocation3], 1 }
 0x163   :  { %1198 = vsyncpa [#allocation3 + $0x1], 1 }
 0x164   :  { %1199 = vsyncpa [#allocation4], 1 }
 0x165   :  { %1201 = vsyncpa [#allocation4 + $0x1], 1 }

</bundles_post_ra>
